<compile_context>
chip_gen: v5e
topology: v5e:2x2
jax: 0.10.0
libtpu: 0.0.40
codegen_flags: <defaults>
</compile_context>

<pallas_src>
import math

import jax
import jax.numpy as jnp
from jax.experimental import pallas as pl
from jax.experimental.pallas import tpu as pltpu


# ----------------------------- in-kernel helpers ------------------------------
def _gelu_tanh(x):
    # tanh-approximate GELU (tanh lowers to the EUP slot). ~1e-3 deviation from
    # UER's erf-based gelu; acceptable per review (swap to erf for bit parity).
    c = math.sqrt(2.0 / math.pi)
    return 0.5 * x * (1.0 + jnp.tanh(c * (x + 0.044715 * x * x * x)))


def _layer_norm(y, gamma, beta, eps=1e-6):
    # UER LayerNorm: gamma * (x - mean) / (std + eps) + beta, unbiased std (H-1).
    Hd = y.shape[-1]
    mean = jnp.mean(y, axis=-1, keepdims=True)
    d = y - mean
    var = jnp.sum(d * d, axis=-1, keepdims=True) * (1.0 / (Hd - 1))
    inv = pl.reciprocal(jnp.sqrt(var) + eps, approx=True)   # EUP
    return gamma * d * inv + beta


# ----------------------------- fused encoder kernel ---------------------------
def _make_encoder_kernel(S, H, heads, mask_mode):
    dh = H // heads
    bf16 = jnp.bfloat16

    def kernel(h_ref, segc_ref, segr_ref,
               wqkv_ref, bqkv_ref, wo_ref, bo_ref,
               g1_ref, be1_ref, w1_ref, b1_ref, w2_ref, b2_ref, g2_ref, be2_ref,
               o_ref, h_sc, mask_sc):
        l = pl.program_id(1)   # layer index (inner, "arbitrary" grid axis)

        @pl.when(l == 0)
        def _init():
            # Residual stream for this batch element lives in f32 VMEM across layers.
            h_sc[...] = h_ref[0].astype(jnp.float32)
            # Build the additive attention mask once per batch element from seg.
            segc = segc_ref[0]                       # (S, 1) int32  (query segment)
            segr = segr_ref[0]                       # (1, S) int32  (key   segment)
            if mask_mode in ("row-wise", "col-wise"):
                # TODO(synk): exact row/col table structure of col_spec_yh.generate_mask
                # is not in the provided source; approximated by same-segment visibility
                # among non-pad keys.
                visible = (segr > 0) & (segc == segr)
            else:
                # cross-wise / cross-and-hier-wise: all non-pad keys visible.
                visible = jnp.broadcast_to(segr > 0, (S, S))
            mask_sc[...] = jnp.where(visible, jnp.float32(0.0), jnp.float32(-10000.0))

        x = h_sc[...]                                # (S, H) f32: layer l-1 output
        x_bf = x.astype(bf16)                        # cast once, reuse (item 12)
        mask = mask_sc[...]                          # (S, S) additive mask

        # ---- fused QKV projection: one lane-dense (S,H)@(H,3H) MXU matmul --------
        # (1/sqrt(dh) already folded into the Q slice of wqkv/bqkv on the host.)
        qkv = jnp.dot(x_bf, wqkv_ref[0],
                      preferred_element_type=jnp.float32) + bqkv_ref[0]   # (S, 3H)

        def to_heads(t):                             # (S, H) -> (heads, S, dh)
            return t.reshape(S, heads, dh).transpose(1, 0, 2)

        q = to_heads(qkv[:, 0 * H:1 * H])
        k = to_heads(qkv[:, 1 * H:2 * H])
        v = to_heads(qkv[:, 2 * H:3 * H])

        # ---- attention scores / softmax (batched over heads) ---------------------
        scores = jnp.einsum("nqd,nkd->nqk", q.astype(bf16), k.astype(bf16),
                            preferred_element_type=jnp.float32)
        scores = scores + mask[None]
        scores = scores - jnp.max(scores, axis=-1, keepdims=True)
        probs = jnp.exp(scores)                                        # EUP
        probs = probs * pl.reciprocal(
            jnp.sum(probs, axis=-1, keepdims=True), approx=True)       # EUP

        ctx = jnp.einsum("nqk,nkd->nqd", probs.astype(bf16), v.astype(bf16),
                         preferred_element_type=jnp.float32)           # (heads, S, dh)
        # Relayout to (S, H) and do ONE dense (S,H)@(H,H) output projection.
        ctx = ctx.transpose(1, 0, 2).reshape(S, H)
        att = jnp.dot(ctx.astype(bf16), wo_ref[0],
                      preferred_element_type=jnp.float32) + bo_ref[0]  # (S, H)

        # ---- residual + LayerNorm 1 ----------------------------------------------
        inter = _layer_norm(att + x, g1_ref[0], be1_ref[0])
        inter_bf = inter.astype(bf16)

        # ---- position-wise feed-forward (gelu) ------------------------------------
        ff = jnp.dot(inter_bf, w1_ref[0],
                     preferred_element_type=jnp.float32) + b1_ref[0]
        ff = _gelu_tanh(ff)
        ff = jnp.dot(ff.astype(bf16), w2_ref[0],
                     preferred_element_type=jnp.float32) + b2_ref[0]

        # ---- residual + LayerNorm 2 -----------------------------------------------
        out = _layer_norm(ff + inter, g2_ref[0], be2_ref[0])
        h_sc[...] = out                              # update resident f32 state

        @pl.when(l == pl.num_programs(1) - 1)
        def _store():
            o_ref[0] = out.astype(o_ref.dtype)

    return kernel


# ----------------------------- host-side weight prep --------------------------
def _stack_params(params, heads):
    """Stack per-layer params along a leading L axis, concatenate Wq|Wk|Wv into one
    (L, H, 3H) matrix with 1/sqrt(dh) folded into the Q slice, and cast all matmul
    weights to bf16 (conversion stays outside the kernel)."""
    H = params[0]["wq"].shape[0]
    dh = H // heads
    scale = 1.0 / math.sqrt(float(dh))
    st = lambda name: jnp.stack([p[name] for p in params], axis=0)
    wqkv = jnp.concatenate([st("wq") * scale, st("wk"), st("wv")], axis=-1)  # (L,H,3H)
    bqkv = jnp.concatenate([st("bq") * scale, st("bk"), st("bv")], axis=-1)  # (L,1,3H)
    return dict(
        wqkv=wqkv.astype(jnp.bfloat16), bqkv=bqkv,
        wo=st("wo").astype(jnp.bfloat16), bo=st("bo"),
        g1=st("g1"), be1=st("be1"),
        w1=st("w1").astype(jnp.bfloat16), b1=st("b1"),
        w2=st("w2").astype(jnp.bfloat16), b2=st("b2"),
        g2=st("g2"), be2=st("be2"),
    )


def _pick_vmem_limit_bytes():
    """~75% of physical VMEM: ~96 MiB on 128 MiB parts (v5e/v6e), ~48 MiB on v7x."""
    phys = 128 * 1024 * 1024
    try:
        info = pltpu.get_tpu_info()
        phys = int(getattr(info, "vmem_capacity_bytes", phys))
    except Exception:
        pass
    return min((phys * 3) // 4, 100 * 1024 * 1024)


# ----------------------------- encoder wrapper --------------------------------
def bert_tab_encoder_forward(emb, seg, params, heads, mask_mode):
    """Mirrors BertTabEncoder.forward (torch.is_tensor(seg) branch, dgl_backend=False).
    All layers run in a single fused pallas_call with grid=(B, L)."""
    assert mask_mode in ["row-wise", "col-wise", "cross-wise", "cross-and-hier-wise"]
    # TODO(synk): dgl_backend / TransformerLayerOnGraph (2-D emb) branch not implemented.
    B, S, H = emb.shape
    L = len(params)
    p = _stack_params(params, heads)

    seg = seg.astype(jnp.int32)
    seg_col = seg[:, :, None]        # (B, S, 1)
    seg_row = seg[:, None, :]        # (B, 1, S)

    kernel = _make_encoder_kernel(S, H, heads, mask_mode)

    def batch_spec(shape):           # indexed by batch, constant across layers
        zeros = (0,) * (len(shape) - 1)
        return pl.BlockSpec((1,) + tuple(shape[1:]), lambda b, l: (b,) + zeros)

    def layer_spec(shape):           # indexed by layer, constant across batch
        zeros = (0,) * (len(shape) - 1)
        return pl.BlockSpec((1,) + tuple(shape[1:]), lambda b, l: (l,) + zeros)

    weight_order = ["wqkv", "bqkv", "wo", "bo",
                    "g1", "be1", "w1", "b1", "w2", "b2", "g2", "be2"]
    in_specs = ([batch_spec(emb.shape), batch_spec(seg_col.shape), batch_spec(seg_row.shape)]
                + [layer_spec(p[n].shape) for n in weight_order])

    return pl.pallas_call(
        kernel,
        out_shape=jax.ShapeDtypeStruct((B, S, H), emb.dtype),
        grid=(B, L),
        in_specs=in_specs,
        out_specs=pl.BlockSpec((1, S, H), lambda b, l: (b, 0, 0)),
        scratch_shapes=[pltpu.VMEM((S, H), jnp.float32),     # resident f32 residual stream
                        pltpu.VMEM((S, S), jnp.float32)],    # per-batch additive mask
        compiler_params=pltpu.CompilerParams(
            dimension_semantics=("parallel", "arbitrary"),
            vmem_limit_bytes=_pick_vmem_limit_bytes()),
    )(emb, seg_col, seg_row, *[p[n] for n in weight_order])


# ----------------------------- pure-JAX reference -----------------------------
def _reference_forward(emb, seg, params, heads, mask_mode):
    """Same math as the kernel (bf16 matmul operands, f32 accumulation) for checking."""
    f32, bf16 = jnp.float32, jnp.bfloat16
    B, S, H = emb.shape
    dh = H // heads
    scale = 1.0 / math.sqrt(float(dh))
    segc = seg[:, :, None].astype(jnp.int32)
    segr = seg[:, None, :].astype(jnp.int32)
    if mask_mode in ("row-wise", "col-wise"):
        visible = (segr > 0) & (segc == segr)
    else:
        visible = jnp.broadcast_to(segr > 0, (B, S, S))
    mask = jnp.where(visible, 0.0, -10000.0).astype(f32)

    def ln(y, gamma, beta, eps=1e-6):
        mean = jnp.mean(y, -1, keepdims=True)
        d = y - mean
        var = jnp.sum(d * d, -1, keepdims=True) / (y.shape[-1] - 1)
        return gamma * d / (jnp.sqrt(var) + eps) + beta

    h = emb.astype(f32)
    for p in params:
        x = h
        xb = x.astype(bf16)
        q = jnp.einsum("bsh,hd->bsd", xb, (p["wq"] * scale).astype(bf16),
                       preferred_element_type=f32) + p["bq"] * scale
        k = jnp.einsum("bsh,hd->bsd", xb, p["wk"].astype(bf16),
                       preferred_element_type=f32) + p["bk"]
        v = jnp.einsum("bsh,hd->bsd", xb, p["wv"].astype(bf16),
                       preferred_element_type=f32) + p["bv"]
        sh = lambda t: t.reshape(B, S, heads, dh).transpose(0, 2, 1, 3)
        s = jnp.einsum("bnqd,bnkd->bnqk", sh(q).astype(bf16), sh(k).astype(bf16),
                       preferred_element_type=f32) + mask[:, None]
        s = s - jnp.max(s, -1, keepdims=True)
        pr = jnp.exp(s)
        pr = pr / jnp.sum(pr, -1, keepdims=True)
        ctx = jnp.einsum("bnqk,bnkd->bnqd", pr.astype(bf16), sh(v).astype(bf16),
                         preferred_element_type=f32)
        ctx = ctx.transpose(0, 2, 1, 3).reshape(B, S, H)
        att = jnp.einsum("bsh,hd->bsd", ctx.astype(bf16), p["wo"].astype(bf16),
                         preferred_element_type=f32) + p["bo"]
        inter = ln(att + x, p["g1"], p["be1"])
        ff = jnp.einsum("bsh,hf->bsf", inter.astype(bf16), p["w1"].astype(bf16),
                        preferred_element_type=f32) + p["b1"]
        ff = _gelu_tanh(ff)
        ff = jnp.einsum("bsf,fh->bsh", ff.astype(bf16), p["w2"].astype(bf16),
                        preferred_element_type=f32) + p["b2"]
        h = ln(ff + inter, p["g2"], p["be2"])
    return h.astype(emb.dtype)


# ----------------------------- deterministic parameter init -------------------
def init_params(key, layers_num, H, F):
    params = []
    for i in range(layers_num):
        keys = jax.random.split(jax.random.fold_in(key, i), 6)
        w = lambda k, shape: (jax.random.normal(k, shape, jnp.float32) * 0.02)
        params.append(dict(
            wq=w(keys[0], (H, H)), bq=jnp.zeros((1, H), jnp.float32),
            wk=w(keys[1], (H, H)), bk=jnp.zeros((1, H), jnp.float32),
            wv=w(keys[2], (H, H)), bv=jnp.zeros((1, H), jnp.float32),
            wo=w(keys[3], (H, H)), bo=jnp.zeros((1, H), jnp.float32),
            g1=jnp.ones((1, H), jnp.float32), be1=jnp.zeros((1, H), jnp.float32),
            w1=w(keys[4], (H, F)), b1=jnp.zeros((1, F), jnp.float32),
            w2=w(keys[5], (F, H)), b2=jnp.zeros((1, H), jnp.float32),
            g2=jnp.ones((1, H), jnp.float32), be2=jnp.zeros((1, H), jnp.float32),
        ))
    return params


if __name__ == "__main__":
    # small "args": layers_num=2, hidden_size=128 (lane-dense per review item 11),
    # heads_num=4, feedforward_size=256, dropout=0 (inference),
    # mask_mode='cross-wise', dgl_backend=False
    B, S, H, HEADS, F, LAYERS = 2, 8, 128, 4, 256, 2
    MASK_MODE = "cross-wise"

    key = jax.random.PRNGKey(0)
    k_emb, k_par = jax.random.split(key)
    emb = jax.random.normal(k_emb, (B, S, H), jnp.float32)
    seg = jnp.array([[1, 1, 2, 2, 3, 3, 0, 0],
                     [1, 2, 2, 3, 3, 3, 3, 0]], dtype=jnp.int32)
    params = init_params(k_par, LAYERS, H, F)

    out = bert_tab_encoder_forward(emb, seg, params, HEADS, MASK_MODE)
    out = jax.block_until_ready(out)
    assert out.shape == (B, S, H) and bool(jnp.all(jnp.isfinite(out)))

    ref = _reference_forward(emb, seg, params, HEADS, MASK_MODE)
    max_err = float(jnp.max(jnp.abs(out - ref)))
    assert max_err < 1e-1, f"kernel/reference mismatch: max abs err {max_err}"
    print("KERNEL_OK")
</pallas_src>

<mosaic_0001>
module attributes {stable_mosaic.version = 11 : i64} {
  func.func @kernel(%arg0: i32, %arg1: i32, %arg2: memref<1x8x128xf32, #tpu.memory_space<vmem>>, %arg3: memref<1x8x1xi32, #tpu.memory_space<vmem>>, %arg4: memref<1x1x8xi32, #tpu.memory_space<vmem>>, %arg5: memref<1x128x384xbf16, #tpu.memory_space<vmem>>, %arg6: memref<1x1x384xf32, #tpu.memory_space<vmem>>, %arg7: memref<1x128x128xbf16, #tpu.memory_space<vmem>>, %arg8: memref<1x1x128xf32, #tpu.memory_space<vmem>>, %arg9: memref<1x1x128xf32, #tpu.memory_space<vmem>>, %arg10: memref<1x1x128xf32, #tpu.memory_space<vmem>>, %arg11: memref<1x128x256xbf16, #tpu.memory_space<vmem>>, %arg12: memref<1x1x256xf32, #tpu.memory_space<vmem>>, %arg13: memref<1x256x128xbf16, #tpu.memory_space<vmem>>, %arg14: memref<1x1x128xf32, #tpu.memory_space<vmem>>, %arg15: memref<1x1x128xf32, #tpu.memory_space<vmem>>, %arg16: memref<1x1x128xf32, #tpu.memory_space<vmem>>, %arg17: memref<1x8x128xf32, #tpu.memory_space<vmem>>, %arg18: memref<8x128xf32, #tpu.memory_space<vmem>>, %arg19: memref<8x8xf32, #tpu.memory_space<vmem>>) attributes {dimension_semantics = [#tpu.dimension_semantics<parallel>, #tpu.dimension_semantics<arbitrary>], iteration_bounds = array<i64: 2, 2>, scalar_prefetch = 0 : i64, scratch_operands = 2 : i64, tpu.core_type = #tpu.core_type<tc>, window_params = [{transform_indices = @transform_0, window_bounds = array<i64: 1, 8, 128>}, {transform_indices = @transform_1, window_bounds = array<i64: 1, 8, 1>}, {transform_indices = @transform_2, window_bounds = array<i64: 1, 1, 8>}, {transform_indices = @transform_3, window_bounds = array<i64: 1, 128, 384>}, {transform_indices = @transform_4, window_bounds = array<i64: 1, 1, 384>}, {transform_indices = @transform_5, window_bounds = array<i64: 1, 128, 128>}, {transform_indices = @transform_6, window_bounds = array<i64: 1, 1, 128>}, {transform_indices = @transform_7, window_bounds = array<i64: 1, 1, 128>}, {transform_indices = @transform_8, window_bounds = array<i64: 1, 1, 128>}, {transform_indices = @transform_9, window_bounds = array<i64: 1, 128, 256>}, {transform_indices = @transform_10, window_bounds = array<i64: 1, 1, 256>}, {transform_indices = @transform_11, window_bounds = array<i64: 1, 256, 128>}, {transform_indices = @transform_12, window_bounds = array<i64: 1, 1, 128>}, {transform_indices = @transform_13, window_bounds = array<i64: 1, 1, 128>}, {transform_indices = @transform_14, window_bounds = array<i64: 1, 1, 128>}, {transform_indices = @transform_15, window_bounds = array<i64: 1, 8, 128>}]} {
    %c0_i32 = arith.constant 0 : i32
    %0 = arith.cmpi eq, %arg1, %c0_i32 : i32
    %1 = arith.extui %0 : i1 to i32
    %c0_i32_0 = arith.constant 0 : i32
    %2 = arith.cmpi ne, %1, %c0_i32_0 : i32
    scf.if %2 {
      %c0_64 = arith.constant 0 : index
      %c0_65 = arith.constant 0 : index
      %c0_66 = arith.constant 0 : index
      %136 = vector.load %arg2[%c0_64, %c0_65, %c0_66] : memref<1x8x128xf32, #tpu.memory_space<vmem>>, vector<1x8x128xf32>
      %137 = vector.shape_cast %136 : vector<1x8x128xf32> to vector<8x128xf32>
      %c0_67 = arith.constant 0 : index
      %c0_68 = arith.constant 0 : index
      %138 = vector.load %arg18[%c0_67, %c0_68] : memref<8x128xf32, #tpu.memory_space<vmem>>, vector<8x128xf32>
      tpu.vector_store %arg18[%c0_67, %c0_68], %137 {strides = array<i32>} : memref<8x128xf32, #tpu.memory_space<vmem>>, vector<8x128xf32>,
      %c0_69 = arith.constant 0 : index
      %c0_70 = arith.constant 0 : index
      %c0_71 = arith.constant 0 : index
      %139 = vector.load %arg4[%c0_69, %c0_70, %c0_71] : memref<1x1x8xi32, #tpu.memory_space<vmem>>, vector<1x1x8xi32>
      %140 = vector.shape_cast %139 : vector<1x1x8xi32> to vector<1x8xi32>
      %c0_i32_72 = arith.constant 0 : i32
      %141 = vector.broadcast %c0_i32_72 : i32 to vector<1x8xi32>
      %142 = arith.cmpi sgt, %140, %141 : vector<1x8xi32>
      %143 = vector.shape_cast %142 : vector<1x8xi1> to vector<1x8xi1>
      %144 = vector.broadcast %143 : vector<1x8xi1> to vector<8x8xi1>
      %cst_73 = arith.constant 0.000000e+00 : f32
      %cst_74 = arith.constant -1.000000e+04 : f32
      %145 = vector.broadcast %cst_73 : f32 to vector<8x8xf32>
      %146 = vector.broadcast %cst_74 : f32 to vector<8x8xf32>
      %147 = arith.select %144, %145, %146 : vector<8x8xi1>, vector<8x8xf32>
      %c0_75 = arith.constant 0 : index
      %c0_76 = arith.constant 0 : index
      %148 = vector.load %arg19[%c0_75, %c0_76] : memref<8x8xf32, #tpu.memory_space<vmem>>, vector<8x8xf32>
      tpu.vector_store %arg19[%c0_75, %c0_76], %147 {strides = array<i32>} : memref<8x8xf32, #tpu.memory_space<vmem>>, vector<8x8xf32>,
    } else {
    }
    %c0 = arith.constant 0 : index
    %c0_1 = arith.constant 0 : index
    %3 = vector.load %arg18[%c0, %c0_1] : memref<8x128xf32, #tpu.memory_space<vmem>>, vector<8x128xf32>
    %4 = arith.truncf %3 : vector<8x128xf32> to vector<8x128xbf16>
    %c0_2 = arith.constant 0 : index
    %c0_3 = arith.constant 0 : index
    %5 = vector.load %arg19[%c0_2, %c0_3] : memref<8x8xf32, #tpu.memory_space<vmem>>, vector<8x8xf32>
    %c0_4 = arith.constant 0 : index
    %c0_5 = arith.constant 0 : index
    %c0_6 = arith.constant 0 : index
    %6 = vector.load %arg5[%c0_4, %c0_5, %c0_6] : memref<1x128x384xbf16, #tpu.memory_space<vmem>>, vector<1x128x384xbf16>
    %7 = vector.shape_cast %6 : vector<1x128x384xbf16> to vector<128x384xbf16>
    %cst = arith.constant dense<0.000000e+00> : vector<8x384xf32>
    %8 = tpu.matmul %4, %7, %cst {dimension_numbers = #tpu.dot_dimension_numbers<[1], [0], [0], [1], [0, 0, 1, 1], [], []>} : vector<8x128xbf16>, vector<128x384xbf16>, vector<8x384xf32> -> vector<8x384xf32>
    %c0_7 = arith.constant 0 : index
    %c0_8 = arith.constant 0 : index
    %c0_9 = arith.constant 0 : index
    %9 = vector.load %arg6[%c0_7, %c0_8, %c0_9] : memref<1x1x384xf32, #tpu.memory_space<vmem>>, vector<1x1x384xf32>
    %10 = vector.shape_cast %9 : vector<1x1x384xf32> to vector<1x384xf32>
    %11 = vector.broadcast %10 : vector<1x384xf32> to vector<8x384xf32>
    %12 = arith.addf %8, %11 : vector<8x384xf32>
    %13 = vector.extract_strided_slice %12 {offsets = [0, 0], sizes = [8, 128], strides = [1, 1]} : vector<8x384xf32> to vector<8x128xf32>
    %14 = vector.shape_cast %13 : vector<8x128xf32> to vector<8x4x32xf32>
    %15 = tpu.transpose %14, [1, 0, 2] : vector<8x4x32xf32> -> vector<4x8x32xf32>
    %16 = vector.extract_strided_slice %12 {offsets = [0, 128], sizes = [8, 128], strides = [1, 1]} : vector<8x384xf32> to vector<8x128xf32>
    %17 = vector.shape_cast %16 : vector<8x128xf32> to vector<8x4x32xf32>
    %18 = tpu.transpose %17, [1, 0, 2] : vector<8x4x32xf32> -> vector<4x8x32xf32>
    %19 = vector.extract_strided_slice %12 {offsets = [0, 256], sizes = [8, 128], strides = [1, 1]} : vector<8x384xf32> to vector<8x128xf32>
    %20 = vector.shape_cast %19 : vector<8x128xf32> to vector<8x4x32xf32>
    %21 = tpu.transpose %20, [1, 0, 2] : vector<8x4x32xf32> -> vector<4x8x32xf32>
    %22 = arith.truncf %15 : vector<4x8x32xf32> to vector<4x8x32xbf16>
    %23 = arith.truncf %18 : vector<4x8x32xf32> to vector<4x8x32xbf16>
    "tpu.trace_start"() <{level = 10 : i32, message = "nqd,nkd->nqk"}> : () -> ()
    %cst_10 = arith.constant dense<0.000000e+00> : vector<4x8x8xf32>
    %24 = tpu.matmul %22, %23, %cst_10 {dimension_numbers = #tpu.dot_dimension_numbers<[2], [2], [1], [1], [0, 0, 0, 1, 1, 1], [0], [0]>} : vector<4x8x32xbf16>, vector<4x8x32xbf16>, vector<4x8x8xf32> -> vector<4x8x8xf32>
    "tpu.trace_stop"() : () -> ()
    %25 = vector.shape_cast %5 : vector<8x8xf32> to vector<1x8x8xf32>
    %26 = vector.broadcast %25 : vector<1x8x8xf32> to vector<4x8x8xf32>
    %27 = arith.addf %24, %26 : vector<4x8x8xf32>
    %cst_11 = arith.constant dense<0xFF800000> : vector<4x8xf32>
    %28 = vector.multi_reduction <maximumf>, %27, %cst_11 [2] : vector<4x8x8xf32> to vector<4x8xf32>
    %29 = vector.shape_cast %28 : vector<4x8xf32> to vector<4x8x1xf32>
    %30 = vector.broadcast %29 : vector<4x8x1xf32> to vector<4x8x8xf32>
    %31 = arith.subf %27, %30 : vector<4x8x8xf32>
    %32 = math.exp %31 : vector<4x8x8xf32>
    %cst_12 = arith.constant dense<0.000000e+00> : vector<4x8xf32>
    %33 = vector.multi_reduction <add>, %32, %cst_12 [2] : vector<4x8x8xf32> to vector<4x8xf32>
    %34 = vector.shape_cast %33 : vector<4x8xf32> to vector<4x8x1xf32>
    %35 = tpu.reciprocal %34 {approx = true} : vector<4x8x1xf32> -> vector<4x8x1xf32>
    %36 = vector.broadcast %35 : vector<4x8x1xf32> to vector<4x8x8xf32>
    %37 = arith.mulf %32, %36 : vector<4x8x8xf32>
    %38 = arith.truncf %37 : vector<4x8x8xf32> to vector<4x8x8xbf16>
    %39 = arith.truncf %21 : vector<4x8x32xf32> to vector<4x8x32xbf16>
    "tpu.trace_start"() <{level = 10 : i32, message = "nqk,nkd->nqd"}> : () -> ()
    %cst_13 = arith.constant dense<0.000000e+00> : vector<4x8x32xf32>
    %40 = tpu.matmul %38, %39, %cst_13 {dimension_numbers = #tpu.dot_dimension_numbers<[2], [1], [1], [2], [0, 0, 0, 1, 1, 2], [0], [0]>} : vector<4x8x8xbf16>, vector<4x8x32xbf16>, vector<4x8x32xf32> -> vector<4x8x32xf32>
    "tpu.trace_stop"() : () -> ()
    %41 = tpu.transpose %40, [1, 0, 2] : vector<4x8x32xf32> -> vector<8x4x32xf32>
    %42 = vector.shape_cast %41 : vector<8x4x32xf32> to vector<8x128xf32>
    %43 = arith.truncf %42 : vector<8x128xf32> to vector<8x128xbf16>
    %c0_14 = arith.constant 0 : index
    %c0_15 = arith.constant 0 : index
    %c0_16 = arith.constant 0 : index
    %44 = vector.load %arg7[%c0_14, %c0_15, %c0_16] : memref<1x128x128xbf16, #tpu.memory_space<vmem>>, vector<1x128x128xbf16>
    %45 = vector.shape_cast %44 : vector<1x128x128xbf16> to vector<128x128xbf16>
    %cst_17 = arith.constant dense<0.000000e+00> : vector<8x128xf32>
    %46 = tpu.matmul %43, %45, %cst_17 {dimension_numbers = #tpu.dot_dimension_numbers<[1], [0], [0], [1], [0, 0, 1, 1], [], []>} : vector<8x128xbf16>, vector<128x128xbf16>, vector<8x128xf32> -> vector<8x128xf32>
    %c0_18 = arith.constant 0 : index
    %c0_19 = arith.constant 0 : index
    %c0_20 = arith.constant 0 : index
    %47 = vector.load %arg8[%c0_18, %c0_19, %c0_20] : memref<1x1x128xf32, #tpu.memory_space<vmem>>, vector<1x1x128xf32>
    %48 = vector.shape_cast %47 : vector<1x1x128xf32> to vector<1x128xf32>
    %49 = vector.broadcast %48 : vector<1x128xf32> to vector<8x128xf32>
    %50 = arith.addf %46, %49 : vector<8x128xf32>
    %51 = arith.addf %50, %3 : vector<8x128xf32>
    %c0_21 = arith.constant 0 : index
    %c0_22 = arith.constant 0 : index
    %c0_23 = arith.constant 0 : index
    %52 = vector.load %arg9[%c0_21, %c0_22, %c0_23] : memref<1x1x128xf32, #tpu.memory_space<vmem>>, vector<1x1x128xf32>
    %53 = vector.shape_cast %52 : vector<1x1x128xf32> to vector<1x128xf32>
    %c0_24 = arith.constant 0 : index
    %c0_25 = arith.constant 0 : index
    %c0_26 = arith.constant 0 : index
    %54 = vector.load %arg10[%c0_24, %c0_25, %c0_26] : memref<1x1x128xf32, #tpu.memory_space<vmem>>, vector<1x1x128xf32>
    %55 = vector.shape_cast %54 : vector<1x1x128xf32> to vector<1x128xf32>
    %cst_27 = arith.constant dense<0.000000e+00> : vector<8xf32>
    %56 = vector.multi_reduction <add>, %51, %cst_27 [1] : vector<8x128xf32> to vector<8xf32>
    %57 = vector.shape_cast %56 : vector<8xf32> to vector<8x1xf32>
    %cst_28 = arith.constant 1.280000e+02 : f32
    %58 = vector.broadcast %cst_28 : f32 to vector<8x1xf32>
    %59 = arith.divf %57, %58 : vector<8x1xf32>
    %60 = vector.broadcast %59 : vector<8x1xf32> to vector<8x128xf32>
    %61 = arith.subf %51, %60 : vector<8x128xf32>
    %62 = arith.mulf %61, %61 : vector<8x128xf32>
    %cst_29 = arith.constant dense<0.000000e+00> : vector<8xf32>
    %63 = vector.multi_reduction <add>, %62, %cst_29 [1] : vector<8x128xf32> to vector<8xf32>
    %64 = vector.shape_cast %63 : vector<8xf32> to vector<8x1xf32>
    %cst_30 = arith.constant 0.00787401571 : f32
    %65 = vector.broadcast %cst_30 : f32 to vector<8x1xf32>
    %66 = arith.mulf %64, %65 : vector<8x1xf32>
    %67 = math.sqrt %66 : vector<8x1xf32>
    %cst_31 = arith.constant 9.99999997E-7 : f32
    %68 = vector.broadcast %cst_31 : f32 to vector<8x1xf32>
    %69 = arith.addf %67, %68 : vector<8x1xf32>
    %70 = tpu.reciprocal %69 {approx = true} : vector<8x1xf32> -> vector<8x1xf32>
    %71 = vector.broadcast %53 : vector<1x128xf32> to vector<8x128xf32>
    %72 = arith.mulf %71, %61 : vector<8x128xf32>
    %73 = vector.broadcast %70 : vector<8x1xf32> to vector<8x128xf32>
    %74 = arith.mulf %72, %73 : vector<8x128xf32>
    %75 = vector.broadcast %55 : vector<1x128xf32> to vector<8x128xf32>
    %76 = arith.addf %74, %75 : vector<8x128xf32>
    %77 = arith.truncf %76 : vector<8x128xf32> to vector<8x128xbf16>
    %c0_32 = arith.constant 0 : index
    %c0_33 = arith.constant 0 : index
    %c0_34 = arith.constant 0 : index
    %78 = vector.load %arg11[%c0_32, %c0_33, %c0_34] : memref<1x128x256xbf16, #tpu.memory_space<vmem>>, vector<1x128x256xbf16>
    %79 = vector.shape_cast %78 : vector<1x128x256xbf16> to vector<128x256xbf16>
    %cst_35 = arith.constant dense<0.000000e+00> : vector<8x256xf32>
    %80 = tpu.matmul %77, %79, %cst_35 {dimension_numbers = #tpu.dot_dimension_numbers<[1], [0], [0], [1], [0, 0, 1, 1], [], []>} : vector<8x128xbf16>, vector<128x256xbf16>, vector<8x256xf32> -> vector<8x256xf32>
    %c0_36 = arith.constant 0 : index
    %c0_37 = arith.constant 0 : index
    %c0_38 = arith.constant 0 : index
    %81 = vector.load %arg12[%c0_36, %c0_37, %c0_38] : memref<1x1x256xf32, #tpu.memory_space<vmem>>, vector<1x1x256xf32>
    %82 = vector.shape_cast %81 : vector<1x1x256xf32> to vector<1x256xf32>
    %83 = vector.broadcast %82 : vector<1x256xf32> to vector<8x256xf32>
    %84 = arith.addf %80, %83 : vector<8x256xf32>
    %cst_39 = arith.constant 5.000000e-01 : f32
    %85 = vector.broadcast %cst_39 : f32 to vector<8x256xf32>
    %86 = arith.mulf %85, %84 : vector<8x256xf32>
    %cst_40 = arith.constant 4.471500e-02 : f32
    %87 = vector.broadcast %cst_40 : f32 to vector<8x256xf32>
    %88 = arith.mulf %87, %84 : vector<8x256xf32>
    %89 = arith.mulf %88, %84 : vector<8x256xf32>
    %90 = arith.mulf %89, %84 : vector<8x256xf32>
    %91 = arith.addf %84, %90 : vector<8x256xf32>
    %cst_41 = arith.constant 0.797884583 : f32
    %92 = vector.broadcast %cst_41 : f32 to vector<8x256xf32>
    %93 = arith.mulf %92, %91 : vector<8x256xf32>
    %94 = math.tanh %93 : vector<8x256xf32>
    %cst_42 = arith.constant 1.000000e+00 : f32
    %95 = vector.broadcast %cst_42 : f32 to vector<8x256xf32>
    %96 = arith.addf %95, %94 : vector<8x256xf32>
    %97 = arith.mulf %86, %96 : vector<8x256xf32>
    %98 = arith.truncf %97 : vector<8x256xf32> to vector<8x256xbf16>
    %c0_43 = arith.constant 0 : index
    %c0_44 = arith.constant 0 : index
    %c0_45 = arith.constant 0 : index
    %99 = vector.load %arg13[%c0_43, %c0_44, %c0_45] : memref<1x256x128xbf16, #tpu.memory_space<vmem>>, vector<1x256x128xbf16>
    %100 = vector.shape_cast %99 : vector<1x256x128xbf16> to vector<256x128xbf16>
    %cst_46 = arith.constant dense<0.000000e+00> : vector<8x128xf32>
    %101 = tpu.matmul %98, %100, %cst_46 {dimension_numbers = #tpu.dot_dimension_numbers<[1], [0], [0], [1], [0, 0, 1, 1], [], []>} : vector<8x256xbf16>, vector<256x128xbf16>, vector<8x128xf32> -> vector<8x128xf32>
    %c0_47 = arith.constant 0 : index
    %c0_48 = arith.constant 0 : index
    %c0_49 = arith.constant 0 : index
    %102 = vector.load %arg14[%c0_47, %c0_48, %c0_49] : memref<1x1x128xf32, #tpu.memory_space<vmem>>, vector<1x1x128xf32>
    %103 = vector.shape_cast %102 : vector<1x1x128xf32> to vector<1x128xf32>
    %104 = vector.broadcast %103 : vector<1x128xf32> to vector<8x128xf32>
    %105 = arith.addf %101, %104 : vector<8x128xf32>
    %106 = arith.addf %105, %76 : vector<8x128xf32>
    %c0_50 = arith.constant 0 : index
    %c0_51 = arith.constant 0 : index
    %c0_52 = arith.constant 0 : index
    %107 = vector.load %arg15[%c0_50, %c0_51, %c0_52] : memref<1x1x128xf32, #tpu.memory_space<vmem>>, vector<1x1x128xf32>
    %108 = vector.shape_cast %107 : vector<1x1x128xf32> to vector<1x128xf32>
    %c0_53 = arith.constant 0 : index
    %c0_54 = arith.constant 0 : index
    %c0_55 = arith.constant 0 : index
    %109 = vector.load %arg16[%c0_53, %c0_54, %c0_55] : memref<1x1x128xf32, #tpu.memory_space<vmem>>, vector<1x1x128xf32>
    %110 = vector.shape_cast %109 : vector<1x1x128xf32> to vector<1x128xf32>
    %cst_56 = arith.constant dense<0.000000e+00> : vector<8xf32>
    %111 = vector.multi_reduction <add>, %106, %cst_56 [1] : vector<8x128xf32> to vector<8xf32>
    %112 = vector.shape_cast %111 : vector<8xf32> to vector<8x1xf32>
    %cst_57 = arith.constant 1.280000e+02 : f32
    %113 = vector.broadcast %cst_57 : f32 to vector<8x1xf32>
    %114 = arith.divf %112, %113 : vector<8x1xf32>
    %115 = vector.broadcast %114 : vector<8x1xf32> to vector<8x128xf32>
    %116 = arith.subf %106, %115 : vector<8x128xf32>
    %117 = arith.mulf %116, %116 : vector<8x128xf32>
    %cst_58 = arith.constant dense<0.000000e+00> : vector<8xf32>
    %118 = vector.multi_reduction <add>, %117, %cst_58 [1] : vector<8x128xf32> to vector<8xf32>
    %119 = vector.shape_cast %118 : vector<8xf32> to vector<8x1xf32>
    %cst_59 = arith.constant 0.00787401571 : f32
    %120 = vector.broadcast %cst_59 : f32 to vector<8x1xf32>
    %121 = arith.mulf %119, %120 : vector<8x1xf32>
    %122 = math.sqrt %121 : vector<8x1xf32>
    %cst_60 = arith.constant 9.99999997E-7 : f32
    %123 = vector.broadcast %cst_60 : f32 to vector<8x1xf32>
    %124 = arith.addf %122, %123 : vector<8x1xf32>
    %125 = tpu.reciprocal %124 {approx = true} : vector<8x1xf32> -> vector<8x1xf32>
    %126 = vector.broadcast %108 : vector<1x128xf32> to vector<8x128xf32>
    %127 = arith.mulf %126, %116 : vector<8x128xf32>
    %128 = vector.broadcast %125 : vector<8x1xf32> to vector<8x128xf32>
    %129 = arith.mulf %127, %128 : vector<8x128xf32>
    %130 = vector.broadcast %110 : vector<1x128xf32> to vector<8x128xf32>
    %131 = arith.addf %129, %130 : vector<8x128xf32>
    %c0_61 = arith.constant 0 : index
    %c0_62 = arith.constant 0 : index
    %132 = vector.load %arg18[%c0_61, %c0_62] : memref<8x128xf32, #tpu.memory_space<vmem>>, vector<8x128xf32>
    tpu.vector_store %arg18[%c0_61, %c0_62], %131 {strides = array<i32>} : memref<8x128xf32, #tpu.memory_space<vmem>>, vector<8x128xf32>,
    %c1_i32 = arith.constant 1 : i32
    %133 = arith.cmpi eq, %arg1, %c1_i32 : i32
    %134 = arith.extui %133 : i1 to i32
    %c0_i32_63 = arith.constant 0 : i32
    %135 = arith.cmpi ne, %134, %c0_i32_63 : i32
    scf.if %135 {
      %c0_64 = arith.constant 0 : index
      %c0_65 = arith.constant 0 : index
      %c0_66 = arith.constant 0 : index
      %136 = vector.load %arg17[%c0_64, %c0_65, %c0_66] : memref<1x8x128xf32, #tpu.memory_space<vmem>>, vector<1x8x128xf32>
      %137 = vector.shape_cast %136 : vector<1x8x128xf32> to vector<8x128xf32>
      %138 = vector.shape_cast %131 : vector<8x128xf32> to vector<1x8x128xf32>
      tpu.vector_store %arg17[%c0_64, %c0_65, %c0_66], %138 {strides = array<i32>} : memref<1x8x128xf32, #tpu.memory_space<vmem>>, vector<1x8x128xf32>,
    } else {
    }
    return
  }
  func.func @transform_0(%arg0: i32, %arg1: i32) -> (i32, i32, i32) {
    %c0_i32 = arith.constant 0 : i32
    %c0_i32_0 = arith.constant 0 : i32
    %c0_i32_1 = arith.constant 0 : i32
    return %arg0, %c0_i32, %c0_i32_0 : i32, i32, i32
  }
  func.func @transform_1(%arg0: i32, %arg1: i32) -> (i32, i32, i32) {
    %c0_i32 = arith.constant 0 : i32
    %c0_i32_0 = arith.constant 0 : i32
    %c0_i32_1 = arith.constant 0 : i32
    return %arg0, %c0_i32, %c0_i32_0 : i32, i32, i32
  }
  func.func @transform_2(%arg0: i32, %arg1: i32) -> (i32, i32, i32) {
    %c0_i32 = arith.constant 0 : i32
    %c0_i32_0 = arith.constant 0 : i32
    %c0_i32_1 = arith.constant 0 : i32
    return %arg0, %c0_i32, %c0_i32_0 : i32, i32, i32
  }
  func.func @transform_3(%arg0: i32, %arg1: i32) -> (i32, i32, i32) {
    %c0_i32 = arith.constant 0 : i32
    %c0_i32_0 = arith.constant 0 : i32
    %c0_i32_1 = arith.constant 0 : i32
    return %arg1, %c0_i32, %c0_i32_0 : i32, i32, i32
  }
  func.func @transform_4(%arg0: i32, %arg1: i32) -> (i32, i32, i32) {
    %c0_i32 = arith.constant 0 : i32
    %c0_i32_0 = arith.constant 0 : i32
    %c0_i32_1 = arith.constant 0 : i32
    return %arg1, %c0_i32, %c0_i32_0 : i32, i32, i32
  }
  func.func @transform_5(%arg0: i32, %arg1: i32) -> (i32, i32, i32) {
    %c0_i32 = arith.constant 0 : i32
    %c0_i32_0 = arith.constant 0 : i32
    %c0_i32_1 = arith.constant 0 : i32
    return %arg1, %c0_i32, %c0_i32_0 : i32, i32, i32
  }
  func.func @transform_6(%arg0: i32, %arg1: i32) -> (i32, i32, i32) {
    %c0_i32 = arith.constant 0 : i32
    %c0_i32_0 = arith.constant 0 : i32
    %c0_i32_1 = arith.constant 0 : i32
    return %arg1, %c0_i32, %c0_i32_0 : i32, i32, i32
  }
  func.func @transform_7(%arg0: i32, %arg1: i32) -> (i32, i32, i32) {
    %c0_i32 = arith.constant 0 : i32
    %c0_i32_0 = arith.constant 0 : i32
    %c0_i32_1 = arith.constant 0 : i32
    return %arg1, %c0_i32, %c0_i32_0 : i32, i32, i32
  }
  func.func @transform_8(%arg0: i32, %arg1: i32) -> (i32, i32, i32) {
    %c0_i32 = arith.constant 0 : i32
    %c0_i32_0 = arith.constant 0 : i32
    %c0_i32_1 = arith.constant 0 : i32
    return %arg1, %c0_i32, %c0_i32_0 : i32, i32, i32
  }
  func.func @transform_9(%arg0: i32, %arg1: i32) -> (i32, i32, i32) {
    %c0_i32 = arith.constant 0 : i32
    %c0_i32_0 = arith.constant 0 : i32
    %c0_i32_1 = arith.constant 0 : i32
    return %arg1, %c0_i32, %c0_i32_0 : i32, i32, i32
  }
  func.func @transform_10(%arg0: i32, %arg1: i32) -> (i32, i32, i32) {
    %c0_i32 = arith.constant 0 : i32
    %c0_i32_0 = arith.constant 0 : i32
    %c0_i32_1 = arith.constant 0 : i32
    return %arg1, %c0_i32, %c0_i32_0 : i32, i32, i32
  }
  func.func @transform_11(%arg0: i32, %arg1: i32) -> (i32, i32, i32) {
    %c0_i32 = arith.constant 0 : i32
    %c0_i32_0 = arith.constant 0 : i32
    %c0_i32_1 = arith.constant 0 : i32
    return %arg1, %c0_i32, %c0_i32_0 : i32, i32, i32
  }
  func.func @transform_12(%arg0: i32, %arg1: i32) -> (i32, i32, i32) {
    %c0_i32 = arith.constant 0 : i32
    %c0_i32_0 = arith.constant 0 : i32
    %c0_i32_1 = arith.constant 0 : i32
    return %arg1, %c0_i32, %c0_i32_0 : i32, i32, i32
  }
  func.func @transform_13(%arg0: i32, %arg1: i32) -> (i32, i32, i32) {
    %c0_i32 = arith.constant 0 : i32
    %c0_i32_0 = arith.constant 0 : i32
    %c0_i32_1 = arith.constant 0 : i32
    return %arg1, %c0_i32, %c0_i32_0 : i32, i32, i32
  }
  func.func @transform_14(%arg0: i32, %arg1: i32) -> (i32, i32, i32) {
    %c0_i32 = arith.constant 0 : i32
    %c0_i32_0 = arith.constant 0 : i32
    %c0_i32_1 = arith.constant 0 : i32
    return %arg1, %c0_i32, %c0_i32_0 : i32, i32, i32
  }
  func.func @transform_15(%arg0: i32, %arg1: i32) -> (i32, i32, i32) {
    %c0_i32 = arith.constant 0 : i32
    %c0_i32_0 = arith.constant 0 : i32
    %c0_i32_1 = arith.constant 0 : i32
    return %arg0, %c0_i32, %c0_i32_0 : i32, i32, i32
  }
}

</mosaic_0001>

<bundles_post_ra>
// kernel: tpu_custom_call.1
= control target key start
LH: loop header
LB: loop body
LE: loop exit
PB: predicated region body
PF: predicated region fallthrough
CT: control target
= control target key end

     0   :  { %s4300_s0 = inlined_call_operand.vmem [shape: f32[2,8,128], index: 0, kind: input, shape index: {}]   ;;  %s4301_s1 = inlined_call_operand.vmem [shape: s32[2,8,1], index: 1, kind: input, shape index: {}]   ;;  %s4302_s2 = inlined_call_operand.hbm [shape: s32[2,1,8], index: 2, kind: input, shape index: {}]   ;;  %s4303_s3 = inlined_call_operand.hbm [shape: bf16[2,128,384], index: 3, kind: input, shape index: {}]   ;;  %s4304_s4 = inlined_call_operand.hbm [shape: f32[2,1,384], index: 4, kind: input, shape index: {}]   ;;  %s4305_s5 = inlined_call_operand.hbm [shape: bf16[2,128,128], index: 5, kind: input, shape index: {}]   ;;  %s4306_s6 = inlined_call_operand.vmem [shape: f32[2,1,128], index: 6, kind: input, shape index: {}]   ;;  %s4307_s7 = inlined_call_operand.vmem [shape: f32[2,1,128], index: 7, kind: input, shape index: {}]   ;;  %s4308_s8 = inlined_call_operand.hbm [shape: f32[2,1,128], index: 8, kind: input, shape index: {}]   ;;  %s4309_s9 = inlined_call_operand.hbm [shape: bf16[2,128,256], index: 9, kind: input, shape index: {}]   ;;  %s4310_s10 = inlined_call_operand.vmem [shape: f32[2,1,256], index: 10, kind: input, shape index: {}]   ;;  %s4311_s11 = inlined_call_operand.hbm [shape: bf16[2,256,128], index: 11, kind: input, shape index: {}]   ;;  %s4312_s12 = inlined_call_operand.vmem [shape: f32[2,1,128], index: 12, kind: input, shape index: {}]   ;;  %s4313_s13 = inlined_call_operand.vmem [shape: f32[2,1,128], index: 13, kind: input, shape index: {}]   ;;  %s4314_s14 = inlined_call_operand.vmem [shape: f32[2,1,128], index: 14, kind: input, shape index: {}]   ;;  %s4315_s15 = inlined_call_operand.hbm [shape: f32[2,8,128], index: 15, kind: output, shape index: {}]  }
   0x1   :  { %4342 = sst [smem:[#allocation40_spill]] %s4300_s0 }
   0x2   :  { %4343 = sst [smem:[#allocation41_spill]] %s4302_s2 }
   0x3   :  { %4344 = sst [smem:[#allocation42_spill]] %s4303_s3 }
   0x4   :  { %4345 = sst [smem:[#allocation43_spill]] %s4304_s4 }
   0x5   :  { %4346 = sst [smem:[#allocation44_spill]] %s4305_s5 }
   0x6   :  { %4347 = sst [smem:[#allocation45_spill]] %s4306_s6 }
   0x7   :  { %4348 = sst [smem:[#allocation46_spill]] %s4307_s7 }
   0x8   :  { %4349 = sst [smem:[#allocation47_spill]] %s4308_s8 }
   0x9   :  { %4350 = sst [smem:[#allocation48_spill]] %s4309_s9 }
   0xa   :  { %4351 = sst [smem:[#allocation49_spill]] %s4310_s10 }
   0xb   :  { %4352 = sst [smem:[#allocation50_spill]] %s4311_s11 }
   0xc   :  { %4353 = sst [smem:[#allocation51_spill]] %s4312_s12 }
   0xd   :  { %4354 = sst [smem:[#allocation52_spill]] %s4313_s13 }
   0xe   :  { %4355 = sst [smem:[#allocation53_spill]] %s4314_s14 }
   0xf   :  { %4356 = sst [smem:[#allocation54_spill]] %s4315_s15 }
  0x10   :  { %20 = vsyncpa [#allocation5], 0 }
  0x11   :  { %22 = vsyncpa [#allocation5 + $0x1], 0 }
  0x12   :  { %23 = vsyncpa [#allocation8], 0 }
  0x13   :  { %25 = vsyncpa [#allocation8 + $0x1], 0 }
  0x14   :  { %26 = vsyncpa [#allocation11], 0 }
  0x15   :  { %28 = vsyncpa [#allocation11 + $0x1], 0 }
  0x16   :  { %29 = vsyncpa [#allocation14], 0 }
  0x17   :  { %31 = vsyncpa [#allocation14 + $0x1], 0 }
  0x18   :  { %32 = vsyncpa [#allocation6], 0 }
  0x19   :  { %34 = vsyncpa [#allocation6 + $0x1], 0  ;;  %s3557_s17 = smov 0   ;;  %s3559_s1 = smov 0  }
  0x1a   :  { %s3561_s18 = smov 0   ;;  %s3563_s19 = smov 0  }
  0x1b   :  { %s3565_s20 = smov 0   ;;  %s3567_s21 = smov 0  }
  0x1c   :  { %s3569_s22 = smov 0   ;;  %s3571_s23 = smov 0  }
  0x1d   :  { %s3573_s24 = smov 0   ;;  %s3575_s25 = smov 0  }
  0x1e   :  { %s3577_s26 = smov 0  }
  0x1f LB: > { %4357 = sst [smem:[#allocation22_spill]] %s3425_s1  ;;  %p119_p0 = scmp.eq.s32.totalorder %s3461_s26, 0  ;;  %s3461_s26 = sphi %s3577_s26, %s40_s26   ;;  %s3457_s25 = sphi %s3575_s25, %s4432_s25   ;;  %s3453_s24 = sphi %s3573_s24, %s4431_s24   ;;  %s3449_s23 = sphi %s3571_s23, %s4430_s23   ;;  %s3445_s22 = sphi %s3569_s22, %s4429_s22   ;;  %s3441_s21 = sphi %s3567_s21, %s4428_s21   ;;  %s3437_s20 = sphi %s3565_s20, %s4427_s20   ;;  %s3433_s19 = sphi %s3563_s19, %s4426_s19   ;;  %s3429_s18 = sphi %s3561_s18, %s4425_s18   ;;  %s3425_s1 = sphi %s3559_s1, %s4424_s1   ;;  %s3421_s17 = sphi %s3557_s17, %s4423_s17  }
  0x20   : > { %4358 = sst [smem:[#allocation23_spill]] %s3429_s18  ;;  %p144_p1 = scmp.ne.s32.totalorder %s3429_s18, %s3425_s1 }
  0x21   : > { %4359 = sst [smem:[#allocation24_spill]] %s3433_s19  ;;  %p4324_p2 = scmp.lt.s32.totalorder %s3461_s26, 4 }
  0x22   : > { %4360 = sst [smem:[#allocation25_spill]] %s3437_s20  ;;  %s3618_s28 = sand.u32 1, %s3461_s26  }
  0x23   : > { %4361 = sst [smem:[#allocation26_spill]] %s3441_s21  ;;  %p146_p3 = por %p144_p1, %p119_p0 }
  0x24   : > { %4362 = sst [smem:[#allocation27_spill]] %s3445_s22  ;;  %s3623_s29 = sand.u32 1, %s3429_s18  }
  0x25   : > { %4363 = sst [smem:[#allocation28_spill]] %s3449_s23  ;;  %s2930_s30 = smul.u32 192, %s3453_s24 }
  0x26   : > { %4364 = sst [smem:[#allocation29_spill]] %s3453_s24  ;;  %s2929_s16 = smul.u32 192, %s3623_s29 }
  0x27   : > { %4365 = sst [smem:[#allocation30_spill]] %s3457_s25  ;;  %p3629_p4 = pnand %p4324_p2, %p146_p3 }
  0x28   : > { %4366 = sst [smem:[#allocation31_spill]] %s3461_s26  ;;  %s521_s10 = scalar_lea.vmem [#allocation7], %s2929_s16 }
  0x29   : > { %s4368_s3 = sld [smem:[#allocation42_spill]]  ;;  %s529_s7 = sshll.u32 %s521_s10, 4  ;;  %s530_s7 = int_to_ptr.vmem [resolvable:$true] %s529_s7 }
  0x2a   : > { %p2585_p5 = scmp.ge.s32.totalorder %s3461_s26, 1  ;;  %s4319_s6 = scalar_lea.sflag [#allocation8], %s3618_s28 }
  0x2b   : > { %s3463_s0 = smov 192   ;;  %s3464_s22 = smov 12  }
  0x2c   : > { %p676_p6 = scmp.lt.s32.totalorder %s3461_s26, 5  ;;  %s2576_s14 = sshll.u32 %s3623_s29, 6 }
  0x2d   : > { %s2862_s27 = sshll.u32 %s3453_s24, 6  ;;  %s4370_s5 = sld [smem:[#allocation44_spill]] }
  0x2e   : > { %p3645_p7 = pnand %p2585_p5, %p676_p6  ;;  %s2863_s10 = sshll.u32 %s3453_s24, 7 }
  0x2f   : > { %s526_s13 = scalar_lea.hbm %s4368_s3, %s2930_s30  ;;  %s562_s3 = scalar_lea.vmem [#allocation10], %s2576_s14 }
  0x30   : > { %s527_s12 = sshll.u32 %s526_s13, 4  ;;  %s570_s23 = sshll.u32 %s562_s3, 4  ;;  %s528_s12 = int_to_ptr.hbm [resolvable:$true] %s527_s12  ;;  %s571_s23 = int_to_ptr.vmem [resolvable:$true] %s570_s23 }
  0x31   : > { %2957 = dma.hbm_to_vmem [thread:$0]  (!%p3629_p4), %s528_s12, 3072, %s530_s7, %s4319_s6, %s3463_s0, %s3463_s0, %s3464_s22  }
  0x32   : > { %s4322_s0 = scalar_lea.sflag [#allocation11], %s3618_s28  ;;  %s4320_s7 = smov 64  }
  0x33   : > { %s567_s16 = scalar_lea.hbm %s4370_s5, %s2862_s27  ;;  %s4321_s12 = smov 4  }
  0x34   : > { %s568_s8 = sshll.u32 %s567_s16, 4  ;;  %s2579_s22 = sshll.u32 %s3623_s29, 7  ;;  %s569_s8 = int_to_ptr.hbm [resolvable:$true] %s568_s8 }
  0x35   : > { %2963 = dma.hbm_to_vmem [thread:$0]  (!%p3629_p4), %s569_s8, 1024, %s571_s23, %s4322_s0, %s4320_s7, %s4320_s7, %s4321_s12  }
  0x36   : > { %s4371_s9 = sld [smem:[#allocation48_spill]]  ;;  %s613_s16 = scalar_lea.vmem [#allocation13], %s2579_s22 }
  0x37   : > { %s621_s6 = sshll.u32 %s613_s16, 4  ;;  %s4323_s5 = scalar_lea.sflag [#allocation14], %s3618_s28  ;;  %s622_s6 = int_to_ptr.vmem [resolvable:$true] %s621_s6 }
  0x38   : > { %s3467_s8 = smov 128   ;;  %s3468_s23 = smov 8  }
  0x39   : > { %s4372_s11 = sld [smem:[#allocation50_spill]]  ;;  %s642_s7 = scalar_lea.vmem [#allocation15], %s2579_s22 }
  0x3a   : > { %s650_s12 = sshll.u32 %s642_s7, 4  ;;  %s3678_s0 = sadd.s32 4294967295, %s3461_s26   ;;  %s3675_s12 = int_to_ptr.vmem [resolvable:$true] %s650_s12 }
  0x3b   : > { %s111_s7 = sadd.s32 1, %s3441_s21  ;;  %p118_p9 = scmp.ne.s32.totalorder %s3441_s21, %s3437_s20 }
  0x3c   : > { %s618_s3 = scalar_lea.hbm %s4371_s9, %s2863_s10  ;;  %p124_p10 = scmp.ne.s32.totalorder %s3437_s20, %s3433_s19 }
  0x3d   : > { %s619_s30 = sshll.u32 %s618_s3, 4  ;;  %p3696_p11 = por %p119_p0, %p118_p9  ;;  %s620_s30 = int_to_ptr.hbm [resolvable:$true] %s619_s30 }
  0x3e   : > { %2969 = dma.hbm_to_vmem [thread:$0]  (!%p3629_p4), %s620_s30, 2048, %s622_s6, %s4323_s5, %s3467_s8, %s3467_s8, %s3468_s23  }
  0x3f   : > { %s647_s3 = scalar_lea.hbm %s4372_s11, %s2863_s10  ;;  %s2572_s6 = sadd.s32 4294967294, %s3461_s26  }
  0x40   : > { %s648_s16 = sshll.u32 %s647_s3, 4  ;;  %s49_s10 = sadd.s32 1, %s3453_s24  ;;  %s3673_s16 = int_to_ptr.hbm [resolvable:$true] %s648_s16 }
  0x41   : > { %s52_s30 = sadd.s32 1, %s3457_s25  ;;  %p50_p8 = scmp.ge.s32.totalorder %s49_s10, 2 }
  0x42   : > { %p125_p12 = scmp.eq.s32.totalorder %s3678_s0, 0  ;;  %s4377_s27 = sadd.s32 1, %s3429_s18 }
  0x43   : > { %s4434_s10 = smov (%p50_p8, %s49_s10), 0  ;;  %s4436_s30 = smov (!%p50_p8, %s52_s30), %s3457_s25 }
  0x44   : > { %4373 = sst [smem:[#allocation32_spill]] %s4434_s10  ;;  %p54_p13 = scmp.ge.s32.totalorder %s4436_s30, 2 }
  0x45   : > { %s134_s8 = ssub.s32 %s3453_s24, %s4434_s10  ;;  %p3706_p1 = por %p125_p12, %p124_p10 }
  0x46   : > { %p135_p3 = scmp.eq.s32.totalorder %s134_s8, 0  ;;  %s4438_s30 = smov (%p54_p13, %s4436_s30), 0 }
  0x47   : > { %4376 = sst [smem:[#allocation33_spill]] %s4438_s30  ;;  %s108_s3 = ssub.s32 %s3457_s25, %s4438_s30 }
  0x48   : > { %s3715_s14 = scalar_select %p135_p3, %s3429_s18, %s4377_s27  }
  0x49   : > { %p150_p0 = scmp.ne.s32.totalorder %s3425_s1, %s3421_s17  ;;  %p109_p5 = scmp.eq.s32.totalorder %s108_s3, 0 }
  0x4a   : > { %4378 = sst [smem:[#allocation34_spill]] %s3715_s14  ;;  %p460_p6 = scmp.eq.s32.totalorder %s3678_s0, 3 }
  0x4b   : > { %p3722_p8 = por %p150_p0, %p125_p12  ;;  %p466_p2 = scmp.eq.s32.totalorder %s2572_s6, 3 }
  0x4c   : > { %s3727_s8 = scalar_select %p109_p5, %s3441_s21, %s111_s7  }
  0x4d   : > { %s4379_s5 = scalar_select %p3722_p8, 1, 0 }
  0x4e   : > { %4381 = sst [smem:[#allocation36_spill]] %s3727_s8  ;;  %p3732_p13 = por %p460_p6, %p118_p9 }
  0x4f   : > { %4380 = sst [smem:[#allocation35_spill]] %s4379_s5  ;;  %p3739_p3 = por %p466_p2, %p124_p10 }
  0x50   : > { %s4382_s9 = scalar_select %p3732_p13, 1, 0 }
  0x51   : > { %s4384_s27 = scalar_select %p3739_p3, 1, 0 }
  0x52   : > { %4383 = sst [smem:[#allocation37_spill]] %s4382_s9  ;;  %s500_s17 = sand.u32 1, %s3441_s21  }
  0x53   : > { %4385 = sst [smem:[#allocation38_spill]] %s4384_s27  ;;  %s503_s6 = scalar_lea.vmem [#allocation4], %s500_s17 }
  0x54   : > { %s4386_s2 = sld [smem:[#allocation41_spill]]  ;;  %s510_s7 = sshll.u32 %s503_s6, 4  ;;  %s511_s7 = int_to_ptr.vmem [resolvable:$true] %s510_s7 }
  0x55   : > { %p4387_p9 = scmp.lt.s32.totalorder %s3461_s26, 4  ;;  %s2931_s8 = smul.u32 3, %s3623_s29 }
  0x56   : > { %s2932_s14 = smul.u32 3, %s3453_s24  ;;  %s501_s21 = scalar_lea.sflag [#allocation5], %s500_s17 }
  0x57   : > { %p2952_p2 = pnand %p4387_p9, %p3696_p11  ;;  %s4388_s4 = sld [smem:[#allocation43_spill]] }
  0x58   : > { %s543_s6 = scalar_lea.vmem [#allocation9], %s2931_s8  ;;  %s4389_s27 = sld [smem:[#allocation47_spill]] }
  0x59   : > { %s4390_s17 = scalar_lea.sflag [#allocation8], %s3618_s28  ;;  %s595_s9 = scalar_lea.vmem [#allocation12], %s3623_s29 }
  0x5a   : > { %s506_s30 = scalar_lea.hbm %s4386_s2, %s3457_s25  ;;  %s551_s2 = sshll.u32 %s543_s6, 4  ;;  %s552_s2 = int_to_ptr.vmem [resolvable:$true] %s551_s2 }
  0x5b   : > { %s508_s10 = sshll.u32 %s506_s30, 4  ;;  %s602_s5 = sshll.u32 %s595_s9, 4  ;;  %s509_s10 = int_to_ptr.hbm [resolvable:$true] %s508_s10  ;;  %s603_s5 = int_to_ptr.vmem [resolvable:$true] %s602_s5 }
  0x5c   : > { %2954 = dma.hbm_to_vmem [thread:$0]  (!%p2952_p2), %s509_s10, 16, %s511_s7, %s501_s21  }
  0x5d   : > { %s547_s3 = scalar_lea.hbm %s4388_s4, %s2932_s14  ;;  %s4391_s21 = scalar_lea.sflag [#allocation11], %s3618_s28 }
  0x5e   : > { %s549_s25 = sshll.u32 %s547_s3, 4  ;;  %s598_s19 = scalar_lea.hbm %s4389_s27, %s3453_s24  ;;  %s550_s25 = int_to_ptr.hbm [resolvable:$true] %s549_s25 }
  0x5f   : > { %2960 = dma.hbm_to_vmem [thread:$0]  (!%p3629_p4), %s550_s25, 48, %s552_s2, %s4390_s17  }
  0x60   : > { %s600_s26 = sshll.u32 %s598_s19, 4  ;;  %s4392_s10 = smov 4   ;;  %s601_s26 = int_to_ptr.hbm [resolvable:$true] %s600_s26 }
  0x61   : > { %2966 = dma.hbm_to_vmem [thread:$0]  (!%p3629_p4), %s601_s26, 16, %s603_s5, %s4391_s21  }
  0x62   : > { %s4393_s14 = smov 64   ;;  %s4394_s8 = scalar_lea.sflag [#allocation14], %s3618_s28 }
  0x63   : > { %2972 = dma.hbm_to_vmem [thread:$0]  (!%p3629_p4), %s3673_s16, 2048, %s3675_s12, %s4394_s8, %s4393_s14, %s4393_s14, %s4392_s10  }
  0x64   : > { %680 = sbr.rel (%p3645_p7) target bundleno = 2157 (0x86d), region = 80 }
  0x69   : > { %s3782_s2 = sand.u32 1, %s3437_s20  }
  0x6a   : > { %s683_s9 = scalar_lea.sflag [#allocation5], %s3782_s2 }
  0x6b   : > { %3400 = dma.done.wait (%p3706_p1), %s683_s9, 16  }
  0x6c   : > { %3402 = vsyncadd (%p3706_p1), %s683_s9, 4294967280  ;;  %s691_s15 = sand.u32 1, %s3678_s0   ;;  %s3792_s19 = sand.u32 1, %s3425_s1  }
  0x6d   : > { %4396 = sst [smem:[#allocation39_spill]] %s3792_s19  ;;  %s2933_s25 = smul.u32 192, %s3792_s19 }
  0x6e   : > { %s692_s26 = scalar_lea.sflag [#allocation8], %s691_s15 }
  0x6f   : > { %s3795_s28 = scalar_lea.vmem [#allocation7], %s2933_s25 }
  0x70   : > { %3404 = dma.done.wait (%p3722_p8), %s692_s26, 3120  }
  0x71   : > { %3406 = vsyncadd (%p3722_p8), %s692_s26, 4294964176  ;;  %s2934_s29 = smul.u32 3, %s3792_s19  ;;  %s2586_s13 = sshll.u32 %s3792_s19, 6 }
  0x72   : > { %s712_s0 = scalar_lea.sflag [#allocation11], %s691_s15  ;;  %s3805_s16 = scalar_lea.vmem [#allocation10], %s2586_s13 }
  0x73   : > { %s3803_s12 = scalar_lea.vmem [#allocation9], %s2934_s29 }
  0x74   : > { %3408 = dma.done.wait (%p3722_p8), %s712_s0, 1040  }
  0x75   : > { %3410 = vsyncadd (%p3722_p8), %s712_s0, 4294966256  ;;  %s2587_s23 = sshll.u32 %s3792_s19, 7  ;;  %s731_s7 = scalar_lea.sflag [#allocation14], %s691_s15 }
  0x76   : > { %s3813_s11 = scalar_lea.vmem [#allocation13], %s2587_s23 }
  0x77   : > { %3412 = dma.done.wait (%p3722_p8), %s731_s7, 4096  }
  0x78   : > { %3414 = vsyncadd (%p3722_p8), %s731_s7, 4294963200  ;;  %s4397_s30 = sld [smem:[#allocation28_spill]]  ;;  %s2589_s6 = sshll.u32 %s3782_s2, 3 }
  0x79   : > { %s4398_s3 = sld [smem:[#allocation27_spill]]  ;;  %s3855_s26 = scalar_lea.vmem [#allocation15], %s2587_s23 }
  0x7a   : > { %s4399_s14 = sld [smem:[#allocation40_spill]]  ;;  %s3857_s29 = scalar_lea.vmem [#allocation16], %s2589_s6 }
  0x7b   : > { %s4401_s13 = sld [smem:[#allocation46_spill]] }
  0x7c   : > { %s4402_s4 = sld [smem:[#allocation49_spill]] }
  0x7d   : > { %s4403_s1 = sld [smem:[#allocation51_spill]] }
  0x7e   : > { %p847_p4 = scmp.lt.s32.totalorder %s4397_s30, 1  ;;  %s4404_s10 = sld [smem:[#allocation52_spill]] }
  0x7f   : > { %p855_p7 = scmp.lt.s32.totalorder %s4398_s3, 1  ;;  %s4405_s15 = sld [smem:[#allocation53_spill]] }
  0x80   : > { %s4440_s30 = smov (!%p847_p4, %s4397_s30), 1  ;;  %p2592_p10 = scmp.ne.s32.totalorder %s4398_s3, 0 }
  0x81   : > { %s3824_s22 = scalar_select %p855_p7, %s4398_s3, 1 }
  0x82   : > { %s2590_s17 = sshll.u32 %s4440_s30, 3  ;;  %878 = sbr.rel (%p2592_p10) target bundleno = 144 (0x90), region = 112 }
  0x83   : > { %s850_s8 = scalar_lea.vmem %s4399_s14, %s2590_s17  ;;  %s860_s0 = scalar_lea.vmem %s4401_s13, %s3824_s22 }
  0x84   : > { %s2591_s7 = sshll.u32 %s3824_s22, 1  ;;  %s867_s19 = scalar_lea.vmem %s4403_s1, %s3824_s22 }
  0x85   : > { %s3841_s24 = scalar_lea.vmem %s4402_s4, %s2591_s7  ;;  %s870_s14 = scalar_lea.vmem %s4404_s10, %s3824_s22 }
  0x86   : > { %s873_s25 = scalar_lea.vmem %s4405_s15, %s3824_s22  ;;  %s4406_s4 = scalar_lea.vmem (!%p2592_p10), [#allocation4], %s3782_s2 }
  0x87   : > { %v879_v0 = vld [vmem:[%s850_s8] sm:$0xff]  ;;  %v3469_v2 = vmov 0   ;;  %vm887_vm1 = vcmask 64512   ;;  %v3470_v5 = vmov -10000.0  }
  0x88   : > { %v881_v1 = vld [vmem:[%s4406_s4] sm:$0x1]  ;;  %880 = vst [vmem:[#allocation2] sm:$0xff] %v879_v0 }
  0x89   : > { %vm882_vm0 = vcmp.gt.s32.totalorder %v881_v1, 0 }
  0x8a   : > { %v883_v3 = vsel %vm882_vm0, 1, %v3469_v2 }
  0x8b   : > { %v884_v4 = vperm.slane %v883_v3, 0 }
  0x8d   : > { %vm885_vm2 = vcmp.eq.s32.totalorder %v884_v4, 1 }
  0x8e   : > { %v886_v6 = vsel %vm885_vm2, 0.0, %v3470_v5 }
  0x8f   : > { %888 = vst.msk [vmem:[#allocation3] sm:$0xff] %vm887_vm1, %v886_v6 }
  0x90 PF: > { %v2679_v7 = vld [vmem:[%s3795_s28 + $0xa8] sm:$0xf]  ;;  %v2887_v8 = vld [vmem:[%s3795_s28 + $0xb0] sm:$0xf0]  ;;  %v2886_v9 = vld [vmem:[%s3795_s28 + $0xac] sm:$0xf] }
  0x91   : > { %v2680_v10 = vor.u32 %v2887_v8, %v2679_v7  ;;  %v2681_v11 = vld [vmem:[%s3795_s28 + $0xb4] sm:$0xf0]  ;;  %v2667_v12 = vld [vmem:[%s3795_s28 + $0x90] sm:$0xf]  ;;  %v2884_v13 = vld [vmem:[%s3795_s28 + $0x98] sm:$0xf0] }
  0x92   : > { %v2684_v14 = vor.u32 %v2886_v9, %v2681_v11  ;;  %v2883_v15 = vld [vmem:[%s3795_s28 + $0x94] sm:$0xf]  ;;  %v2669_v16 = vld [vmem:[%s3795_s28 + $0x9c] sm:$0xf0]  ;;  %v2668_v17 = vor.u32 %v2884_v13, %v2667_v12  ;;  %v2655_v19 = vld [vmem:[%s3795_s28 + $0x78] sm:$0xf] }
  0x93   : > { %1060 = vmatpush.bf16.msra.mxu0 %v2680_v10  ;;  %v2672_v18 = vor.u32 %v2883_v15, %v2669_v16  ;;  %v2881_v20 = vld [vmem:[%s3795_s28 + $0x80] sm:$0xf0]  ;;  %v2880_v21 = vld [vmem:[%s3795_s28 + $0x7c] sm:$0xf]  ;;  %v2657_v22 = vld [vmem:[%s3795_s28 + $0x84] sm:$0xf0] }
  0x94   : > { %1073 = vmatpush.bf16.msra.mxu1 %v2684_v14  ;;  %v2656_v23 = vor.u32 %v2881_v20, %v2655_v19  ;;  %v2660_v24 = vor.u32 %v2880_v21, %v2657_v22  ;;  %v2643_v25 = vld [vmem:[%s3795_s28 + $0x60] sm:$0xf]  ;;  %v2878_v26 = vld [vmem:[%s3795_s28 + $0x68] sm:$0xf0]  ;;  %v2877_v27 = vld [vmem:[%s3795_s28 + $0x64] sm:$0xf] }
  0x95   : > { %v2645_v28 = vld [vmem:[%s3795_s28 + $0x6c] sm:$0xf0]  ;;  %v2631_v29 = vld [vmem:[%s3795_s28 + $0x48] sm:$0xf]  ;;  %v2644_v30 = vor.u32 %v2878_v26, %v2643_v25  ;;  %v2875_v31 = vld [vmem:[%s3795_s28 + $0x50] sm:$0xf0] }
  0x96   : > { %v2648_v32 = vor.u32 %v2877_v27, %v2645_v28  ;;  %v2874_v33 = vld [vmem:[%s3795_s28 + $0x4c] sm:$0xf]  ;;  %v2633_v34 = vld [vmem:[%s3795_s28 + $0x54] sm:$0xf0]  ;;  %v2632_v35 = vor.u32 %v2875_v31, %v2631_v29  ;;  %v2619_v37 = vld [vmem:[%s3795_s28 + $0x30] sm:$0xf] }
  0x97   : > { %1061 = vmatpush.bf16.msra.mxu0 %v2668_v17  ;;  %v2636_v36 = vor.u32 %v2874_v33, %v2633_v34  ;;  %v2872_v38 = vld [vmem:[%s3795_s28 + $0x38] sm:$0xf0]  ;;  %v2871_v39 = vld [vmem:[%s3795_s28 + $0x34] sm:$0xf]  ;;  %v2621_v40 = vld [vmem:[%s3795_s28 + $0x3c] sm:$0xf0] }
  0x98   : > { %1074 = vmatpush.bf16.msra.mxu1 %v2672_v18  ;;  %v2620_v41 = vor.u32 %v2872_v38, %v2619_v37  ;;  %v2624_v42 = vor.u32 %v2871_v39, %v2621_v40  ;;  %v2607_v43 = vld [vmem:[%s3795_s28 + $0x18] sm:$0xf]  ;;  %v2869_v44 = vld [vmem:[%s3795_s28 + $0x20] sm:$0xf0]  ;;  %v2868_v45 = vld [vmem:[%s3795_s28 + $0x1c] sm:$0xf] }
  0x99   : > { %v2609_v46 = vld [vmem:[%s3795_s28 + $0x24] sm:$0xf0]  ;;  %v2608_v47 = vor.u32 %v2869_v44, %v2607_v43  ;;  %v2595_v49 = vld [vmem:[%s3795_s28] sm:$0xf]  ;;  %v2866_v50 = vld [vmem:[%s3795_s28 + $0x8] sm:$0xf0] }
  0x9a   : > { %v2612_v48 = vor.u32 %v2868_v45, %v2609_v46  ;;  %v2865_v51 = vld [vmem:[%s3795_s28 + $0x4] sm:$0xf]  ;;  %v2597_v52 = vld [vmem:[%s3795_s28 + $0xc] sm:$0xf0]  ;;  %v2596_v53 = vor.u32 %v2866_v50, %v2595_v49  ;;  %s3471_s1 = smov 64   ;;  %s3472_s20 = smov 32  }
  0x9b   : > { %1062 = vmatpush.bf16.msra.mxu0 %v2656_v23  ;;  %v3894_v54 = vld [vmem:[#allocation2] sm:$0xff]  ;;  %v2600_v55 = vor.u32 %v2865_v51, %v2597_v52  ;;  %v3903_v57 = vld [vmem:[%s3803_s12] sm:$0x7]  ;;  %s3473_s18 = smov 96   ;;  %v3474_v3 = vmov 1983009808  }
  0x9c   : > { %1075 = vmatpush.bf16.msra.mxu1 %v2660_v24  ;;  %v3898_v56 = vpack.c.bf16 %v3894_v54, %v3894_v54  ;;  %v926_v58 = vperm.slane %v3903_v57, 0  ;;  %v927_v59 = vperm.slane %v3903_v57, 1  ;;  %v1115_v4 = vunpack.c.l.s4 %v3474_v3  ;;  %s4407_s23 = sld [smem:[#allocation45_spill]] }
  0x9d   : > { %vm1110_vm3 = vcmask 1047556   ;;  %v3475_v16 = vmov 1934713408   ;;  %vm1468_vm4 = vcmask 261120   ;;  %vm1545_vm5 = vcmask 64512   ;;  %s4415_s9 = sld [smem:[#allocation27_spill]] }
  0x9e   : > { %v3914_v12 = vunpack.c.0.s8 %v1115_v4  ;;  %v1139_v17 = vunpack.c.l.s4 %v3475_v16  ;;  %vm1601_vm6 = vcmask 1043456   ;;  %vm1798_vm7 = vcmask 523264  }
  0x9f   : > { %1063 = vmatpush.bf16.msra.mxu0 %v2644_v30  ;;  %vm1800_vm8 = vcmask 785408  }
  0xa0   : > { %1076 = vmatpush.bf16.msra.mxu1 %v2648_v32  ;;  %v3923_v25 = vunpack.c.0.s8 %v1139_v17 }
  0xa2   : > { %s4408_s27 = scalar_lea.vmem %s4407_s23, %s3824_s22 }
  0xa3   : > { %1064 = vmatpush.bf16.msra.mxu0 %v2632_v35  ;;  %p2857_p11 = scmp.ne.s32.totalorder %s4415_s9, 1 }
  0xa4   : > { %1077 = vmatpush.bf16.msra.mxu1 %v2636_v36 }
  0xa7   : > { %1065 = vmatpush.bf16.msra.mxu0 %v2620_v41 }
  0xa8   : > { %1078 = vmatpush.bf16.msra.mxu1 %v2624_v42 }
  0xab   : > { %1066 = vmatpush.bf16.msra.mxu0 %v2608_v47 }
  0xac   : > { %1079 = vmatpush.bf16.msra.mxu1 %v2612_v48 }
  0xaf   : > { %1067 = vmatpush.bf16.msra.mxu0 %v2596_v53 }
  0xb0   : > { %1080 = vmatpush.bf16.msra.mxu1 %v2600_v55 }
  0xb2   : > { %1068 = vmatmul.bf16.vlgmr.msra.gmra.mxu0 %v3898_v56 }
  0xb3   : > { %1081 = vmatmul.bf16.vlgmr.msra.gmra.mxu1 %v3898_v56 }
 0x12f   : > { %v1069_v60 = vpop.f32.mrf.mxu0 }
 0x130   : > { %v1070_v61 = vadd.f32 %v1069_v60, %v926_v58  ;;  %v1082_v62 = vpop.f32.mrf.mxu1 }
 0x131   : > { %v1083_v63 = vadd.f32 %v1082_v62, %v927_v59 }
 0x132   : > { %1103 = vrot.lane.b32.xlu2 %v1070_v61, %s3471_s1  ;;  %v1112_v10 = vrot.slane %v1070_v61, 4 }
 0x133   : > { %1227 = vrot.lane.b32.xlu1 %v1083_v63, %s3472_s20  ;;  %1221 = vrot.lane.b32.xlu0 %v1083_v63, %s3473_s18  ;;  %v1232_v23 = vrot.slane %v1083_v63, 4 }
 0x137   : > { %v1071_v0 = vpop.f32.mrf.mxu0 }
 0x138   : > { %v1084_v1 = vpop.f32.mrf.mxu1 }
 0x13a   : > { %1106 = vrot.lane.b32.xlu2 %v1070_v61, %s3472_s20 }
 0x13b   : > { %1224 = vrot.lane.b32.xlu0 %v1083_v63, %s3471_s1  ;;  %1100 = vrot.lane.b32.xlu1 %v1070_v61, %s3473_s18 }
 0x18c   : > { %v1104_v2 = vpop.permute.xlu2 %1103 }
 0x18d   : > { %v1109_v5 = vrot.slane %v1104_v2, 4  ;;  %v1113_v18 = vsel %vm1110_vm3, %v1104_v2, %v1112_v10 }
 0x18e   : > { %v1121_v24 = vperm.slane %v1113_v18, %v3914_v12 }
 0x18f   : > { %v1111_v13 = vsel %vm1110_vm3, %v1109_v5, %v1070_v61 }
 0x190   : > { %v1117_v20 = vperm.slane %v1111_v13, %v3914_v12  ;;  %v1148_v43 = vrot.slane %v1121_v24, 4 }
 0x192   : > { %v1136_v35 = vrot.slane %v1117_v20, 4 }
 0x194   : > { %v1107_v14 = vpop.permute.xlu2 %1106 }
 0x195   : > { %v1122_v21 = vrot.slane %v1107_v14, 4 }
 0x1a5   : > { %v1228_v6 = vpop.permute.xlu1 %1227  ;;  %v1222_v7 = vpop.permute.xlu0 %1221 }
 0x1a6   : > { %v1242_v8 = vrot.slane %v1228_v6, 4  ;;  %v1244_v9 = vrot.slane %v1222_v7, 4 }
 0x1a8   : > { %v1245_v11 = vsel %vm1110_vm3, %v1228_v6, %v1244_v9  ;;  %v1243_v15 = vsel %vm1110_vm3, %v1242_v8, %v1222_v7 }
 0x1a9   : > { %v1253_v19 = vperm.slane %v1245_v11, %v3914_v12  ;;  %v1249_v22 = vperm.slane %v1243_v15, %v3914_v12 }
 0x1ab   : > { %v1266_v32 = vrot.slane %v1253_v19, 4  ;;  %v1254_v36 = vrot.slane %v1249_v22, 4 }
 0x1ad   : > { %v1225_v26 = vpop.permute.xlu0 %1224  ;;  %v1101_v27 = vpop.permute.xlu1 %1100 }
 0x1ae   : > { %v1230_v28 = vrot.slane %v1225_v26, 4  ;;  %v1233_v29 = vsel %vm1110_vm3, %v1225_v26, %v1232_v23  ;;  %v1123_v30 = vsel %vm1110_vm3, %v1122_v21, %v1101_v27  ;;  %v1124_v31 = vrot.slane %v1101_v27, 4 }
 0x1af   : > { %v1241_v33 = vperm.slane %v1233_v29, %v3914_v12  ;;  %v1129_v34 = vperm.slane %v1123_v30, %v3914_v12 }
 0x1b0   : > { %v1231_v37 = vsel %vm1110_vm3, %v1230_v28, %v1083_v63  ;;  %v1125_v38 = vsel %vm1110_vm3, %v1107_v14, %v1124_v31 }
 0x1b1   : > { %v1237_v39 = vperm.slane %v1231_v37, %v3914_v12  ;;  %v1267_v40 = vsel %vm1110_vm3, %v1266_v32, %v1241_v33  ;;  %v1268_v41 = vrot.slane %v1241_v33, 4  ;;  %v1133_v42 = vperm.slane %v1125_v38, %v3914_v12 }
 0x1b2   : > { %v1273_v44 = vperm.slane %v1267_v40, %v3923_v25  ;;  %v1134_v45 = vrot.slane %v1129_v34, 4  ;;  %v1137_v46 = vsel %vm1110_vm3, %v1129_v34, %v1136_v35 }
 0x1b3   : > { %v1255_v47 = vsel %vm1110_vm3, %v1254_v36, %v1237_v39  ;;  %v1256_v48 = vrot.slane %v1237_v39, 4  ;;  %v1269_v49 = vsel %vm1110_vm3, %v1253_v19, %v1268_v41  ;;  %v1145_v50 = vperm.slane %v1137_v46, %v3923_v25 }
 0x1b4   : > { %v1261_v51 = vperm.slane %v1255_v47, %v3923_v25  ;;  %v1277_v52 = vperm.slane %v1269_v49, %v3923_v25  ;;  %v1282_v53 = vrot.slane %v1273_v44, 4  ;;  %v1135_v55 = vsel %vm1110_vm3, %v1134_v45, %v1117_v20  ;;  %v2687_v47 = vld [vmem:[%s3795_s28 + $0xb0] sm:$0xf] }
 0x1b5   : > { %v1257_v58 = vsel %vm1110_vm3, %v1249_v22, %v1256_v48  ;;  %v1141_v59 = vperm.slane %v1135_v55, %v3923_v25  ;;  %v1146_v60 = vrot.slane %v1133_v42, 4  ;;  %v1149_v61 = vsel %vm1110_vm3, %v1133_v42, %v1148_v43  ;;  %v2888_v48 = vld [vmem:[%s3795_s28 + $0xb8] sm:$0xf0] }
 0x1b6   : > { %v1265_v62 = vperm.slane %v1257_v58, %v3923_v25  ;;  %v1278_v63 = vrot.slane %v1261_v51, 4  ;;  %v1283_v0 = vsel %vm1110_vm3, 0.0, %v1282_v53  ;;  %v1284_v1 = vrot.slane %v1277_v52, 4 }
 0x1b7   : > { %v1147_v2 = vsel %vm1110_vm3, %v1146_v60, %v1121_v24  ;;  %v1157_v3 = vperm.slane %v1149_v61, %v3923_v25  ;;  %v1158_v4 = vrot.slane %v1141_v59, 4  ;;  %v1160_v5 = vrot.slane %v1145_v50, 4 }
 0x1b8   : > { %v1279_v6 = vsel %vm1110_vm3, 0.0, %v1278_v63  ;;  %v1280_v7 = vrot.slane %v1265_v62, 4  ;;  %v1285_v8 = vsel %vm1110_vm3, 0.0, %v1284_v1  ;;  %v1297_v9 = vsel %vm1110_vm3, %v1284_v1, %v1273_v44 }
 0x1b9   : > { %v1301_v10 = vperm.slane %v1297_v9, %v3914_v12  ;;  %v1302_v11 = vrot.slane %v1285_v8, 4  ;;  %v1153_v13 = vperm.slane %v1147_v2, %v3923_v25  ;;  %v1159_v14 = vsel %vm1110_vm3, 0.0, %v1158_v4 }
 0x1ba   : > { %v1281_v15 = vsel %vm1110_vm3, 0.0, %v1280_v7  ;;  %v1161_v16 = vsel %vm1110_vm3, 0.0, %v1160_v5  ;;  %v1164_v17 = vrot.slane %v1157_v3, 4  ;;  %v1166_v18 = vsel %vm1110_vm3, %v1160_v5, %v1141_v59 }
 0x1bb   : > { %v1291_v19 = vrot.slane %v1281_v15, 4  ;;  %v1303_v20 = vsel %vm1110_vm3, %v1302_v11, %v1283_v0  ;;  %v1162_v21 = vrot.slane %v1153_v13, 4  ;;  %v1171_v22 = vrot.slane %v1161_v16, 4  ;;  %v2885_v11 = vld [vmem:[%s3795_s28 + $0xa0] sm:$0xf0] }
 0x1bc   : > { %v1307_v23 = vperm.slane %v1303_v20, %v3914_v12  ;;  %v1165_v24 = vsel %vm1110_vm3, 0.0, %v1164_v17  ;;  %v1286_v26 = vsel %vm1110_vm3, %v1280_v7, %v1261_v51  ;;  %v1322_v27 = vrot.slane %v1301_v10, 4 }
 0x1bd   : > { %v1163_v28 = vsel %vm1110_vm3, 0.0, %v1162_v21  ;;  %v1172_v29 = vsel %vm1110_vm3, %v1171_v22, %v1159_v14  ;;  %v1182_v30 = vrot.slane %v1165_v24, 4  ;;  %v1290_v31 = vperm.slane %v1286_v26, %v3914_v12  ;;  %v2882_v22 = vld [vmem:[%s3795_s28 + $0x88] sm:$0xf0] }
 0x1be   : > { %v1292_v32 = vsel %vm1110_vm3, %v1291_v19, %v1279_v6  ;;  %v1320_v33 = vrot.slane %v1307_v23, 4  ;;  %v1323_v34 = vsel %vm1110_vm3, %v1307_v23, %v1322_v27  ;;  %v1170_v35 = vperm.slane %v1166_v18, %v3914_v12 }
 0x1bf   : > { %v1296_v36 = vperm.slane %v1292_v32, %v3914_v12  ;;  %v1310_v37 = vrot.slane %v1290_v31, 4  ;;  %v1331_v38 = vperm.slane %v1323_v34, %v3923_v25  ;;  %v1176_v39 = vperm.slane %v1172_v29, %v3914_v12 }
 0x1c0   : > { %v1321_v40 = vsel %vm1110_vm3, %v1320_v33, %v1301_v10  ;;  %v1177_v41 = vsel %vm1110_vm3, %v1164_v17, %v1153_v13  ;;  %v1183_v42 = vsel %vm1110_vm3, %v1182_v30, %v1163_v28  ;;  %v1190_v43 = vrot.slane %v1170_v35, 4  ;;  %v2675_v10 = vld [vmem:[%s3795_s28 + $0x98] sm:$0xf]  ;;  %v2663_v17 = vld [vmem:[%s3795_s28 + $0x80] sm:$0xf] }
 0x1c1   : > { %v1308_v44 = vrot.slane %v1296_v36, 4  ;;  %v1327_v45 = vperm.slane %v1321_v40, %v3923_v25  ;;  %v1311_v46 = vsel %vm1110_vm3, %v1296_v36, %v1310_v37  ;;  %v1181_v50 = vperm.slane %v1177_v41, %v3914_v12  ;;  %v2879_v36 = vld [vmem:[%s3795_s28 + $0x70] sm:$0xf0]  ;;  %v2639_v37 = vld [vmem:[%s3795_s28 + $0x50] sm:$0xf] }
 0x1c2   : > { %v1319_v49 = vperm.slane %v1311_v46, %v3923_v25  ;;  %v1187_v51 = vperm.slane %v1183_v42, %v3914_v12  ;;  %v1188_v52 = vrot.slane %v1176_v39, 4  ;;  %v1191_v58 = vsel %vm1110_vm3, %v1176_v39, %v1190_v43  ;;  %v2876_v39 = vld [vmem:[%s3795_s28 + $0x58] sm:$0xf0]  ;;  %v2627_v41 = vld [vmem:[%s3795_s28 + $0x38] sm:$0xf] }
 0x1c3   : > { %v1309_v53 = vsel %vm1110_vm3, %v1308_v44, %v1290_v31  ;;  %v1332_v55 = vrot.slane %v1327_v45, 4  ;;  %v2688_v59 = vor.u32 %v2888_v48, %v2687_v47  ;;  %v1336_v61 = vrot.slane %v1331_v38, 4  ;;  %v2873_v42 = vld [vmem:[%s3795_s28 + $0x40] sm:$0xf0]  ;;  %v2870_v46 = vld [vmem:[%s3795_s28 + $0x28] sm:$0xf0] }
 0x1c4   : > { %v1315_v60 = vperm.slane %v1309_v53, %v3923_v25  ;;  %v1338_v62 = vrot.slane %v1319_v49, 4  ;;  %v1200_v63 = vrot.slane %v1187_v51, 4  ;;  %v3985_v0 = vperm.slane %v1191_v58, %v3923_v25 }
 0x1c5   : > { %v1202_v1 = vrot.slane %v1181_v50, 4  ;;  %1086 = vmatpush.bf16.msra.mxu2 %v2688_v59  ;;  %v1189_v8 = vsel %vm1110_vm3, %v1188_v52, %v1170_v35  ;;  %v1337_v16 = vsel %vm1110_vm3, %v1336_v61, %v1319_v49  ;;  %v2676_v26 = vor.u32 %v2885_v11, %v2675_v10  ;;  %v2651_v35 = vld [vmem:[%s3795_s28 + $0x68] sm:$0xf]  ;;  %v891_v59 = vld [vmem:[#allocation3] sm:$0xff] }
 0x1c6   : > { %v1333_v2 = vsel %vm1110_vm3, %v1332_v55, %v1315_v60  ;;  %v1339_v3 = vsel %vm1110_vm3, %v1331_v38, %v1338_v62  ;;  %v1334_v4 = vrot.slane %v1315_v60, 4  ;;  %v1201_v5 = vsel %vm1110_vm3, %v1200_v63, %v1181_v50  ;;  %v2603_v49 = vld [vmem:[%s3795_s28 + $0x8] sm:$0xf]  ;;  %v2867_v50 = vld [vmem:[%s3795_s28 + $0x10] sm:$0xf0] }
 0x1c7   : > { %v1464_v6 = vpack.c.bf16 %v1333_v2, %v1333_v2  ;;  %v1467_v7 = vpack.c.bf16 %v1339_v3, %v1339_v3  ;;  %v1207_v9 = vperm.slane %v1201_v5, %v3923_v25  ;;  %v1203_v14 = vsel %vm1110_vm3, %v1187_v51, %v1202_v1 }
 0x1c8   : > { %v1335_v13 = vsel %vm1110_vm3, %v1327_v45, %v1334_v4  ;;  %v1218_v15 = vrot.slane %v3985_v0, 4  ;;  %v1195_v23 = vperm.slane %v1189_v8, %v3923_v25  ;;  %v1211_v24 = vperm.slane %v1203_v14, %v3923_v25  ;;  %v2615_v45 = vld [vmem:[%s3795_s28 + $0x20] sm:$0xf] }
 0x1c9   : > { %v1473_v18 = vsel %vm1468_vm4, %v1464_v6, 0  ;;  %v1530_v19 = vsel %vm1468_vm4, %v1467_v7, 0  ;;  %v1465_v20 = vpack.c.bf16 %v1335_v13, %v1335_v13  ;;  %v1212_v21 = vrot.slane %v1207_v9, 4  ;;  %1087 = vmatpush.bf16.msra.mxu2 %v2676_v26 }
 0x1ca   : > { %1482 = vmatpush.bf16.xpose.msra.mxu3 %v1473_v18  ;;  %1539 = vmatpush.bf16.xpose.msrb.mxu0 %v1530_v19  ;;  %v1466_v28 = vpack.c.bf16 %v1337_v16, %v1337_v16  ;;  %v1219_v30 = vsel %vm1110_vm3, %v1211_v24, %v1218_v15  ;;  %v2664_v31 = vor.u32 %v2882_v22, %v2663_v17  ;;  %v1214_v43 = vrot.slane %v1195_v23, 4 }
 0x1cb   : > { %v1492_v27 = vsel %vm1468_vm4, %v1465_v20, 0  ;;  %v1213_v29 = vsel %vm1110_vm3, %v1212_v21, %v1195_v23  ;;  %v1463_v33 = vpack.c.bf16 %v1219_v30, %v1219_v30  ;;  %v2652_v38 = vor.u32 %v2879_v36, %v2651_v35 }
 0x1cc   : > { %v1460_v32 = vpack.c.bf16 %v1213_v29, %v1213_v29  ;;  %v1511_v34 = vsel %vm1468_vm4, %v1466_v28, 0  ;;  %v2640_v40 = vor.u32 %v2876_v39, %v2639_v37  ;;  %v2628_v44 = vor.u32 %v2873_v42, %v2627_v41 }
 0x1cd   : > { %1088 = vmatpush.bf16.msra.mxu2 %v2664_v31  ;;  %v1215_v47 = vsel %vm1110_vm3, %v1207_v9, %v1214_v43  ;;  %v2616_v48 = vor.u32 %v2870_v46, %v2615_v45  ;;  %v2604_v52 = vor.u32 %v2867_v50, %v2603_v49  ;;  %v1216_v53 = vrot.slane %v1211_v24, 4 }
 0x1ce   : > { %v1461_v51 = vpack.c.bf16 %v1215_v47, %v1215_v47  ;;  %v928_v6 = vperm.slane %v3903_v57, 2 }
 0x1cf   : > { %v1217_v55 = vsel %vm1110_vm3, %v1216_v53, %v3985_v0 }
 0x1d0   : > { %v1462_v58 = vpack.c.bf16 %v1217_v55, %v1217_v55 }
 0x1d1   : > { %2689 = vmatmul.msk.bf16.vlgmr.msra.gmra.mxu3 %vm1468_vm4, %v1460_v32  ;;  %2692 = vmatmul.msk.bf16.vlgmr.msrb.gmra.mxu0 %vm1468_vm4, %v1463_v33 }
 0x1d2   : > { %1501 = vmatpush.bf16.xpose.msrb.mxu3 %v1492_v27  ;;  %1089 = vmatpush.bf16.msra.mxu2 %v2652_v38 }
 0x1d6   : > { %1090 = vmatpush.bf16.msra.mxu2 %v2640_v40 }
 0x1da   : > { %1520 = vmatpush.bf16.xpose.msra.mxu3 %v1511_v34  ;;  %1091 = vmatpush.bf16.msra.mxu2 %v2628_v44 }
 0x1de   : > { %1092 = vmatpush.bf16.msra.mxu2 %v2616_v48 }
 0x1e1   : > { %2690 = vmatmul.msk.bf16.vlgmr.msrb.gmra.mxu3 %vm1468_vm4, %v1461_v51 }
 0x1e2   : > { %1093 = vmatpush.bf16.msra.mxu2 %v2604_v52 }
 0x1e5   : > { %1094 = vmatmul.bf16.vlgmr.msra.gmra.mxu2 %v3898_v56 }
 0x1f1   : > { %2691 = vmatmul.msk.bf16.vlgmr.msra.gmra.mxu3 %vm1468_vm4, %v1462_v58 }
 0x24e   : > { %v1541_v60 = vpop.f32.mrf.mxu0 }
 0x24f   : > { %v1542_v61 = vadd.f32 %v1541_v60, %v891_v59 }
 0x251   : > { %v1555_v62 = vsel %vm1545_vm5, %v1542_v61, -inf }
 0x252   : > { %1556 = vmax.xlane.f32.xlu2 %v1555_v62 }
 0x254   : > { %v1484_v63 = vpop.f32.mrf.mxu3 }
 0x255   : > { %v1485_v1 = vadd.f32 %v1484_v63, %v891_v59 }
 0x256   : > { %v1543_v2 = vpop.f32.mrf.mxu0 }
 0x257   : > { %v1546_v3 = vsel %vm1545_vm5, %v1485_v1, -inf }
 0x258   : > { %1547 = vmax.xlane.f32.xlu0 %v1546_v3 }
 0x25c   : > { %v1486_v56 = vpop.f32.mrf.mxu3 }
 0x264   : > { %v1503_v4 = vpop.f32.mrf.mxu3 }
 0x265   : > { %v1504_v5 = vadd.f32 %v1503_v4, %v891_v59 }
 0x267   : > { %v1549_v0 = vsel %vm1545_vm5, %v1504_v5, -inf }
 0x268   : > { %1550 = vmax.xlane.f32.xlu2 %v1549_v0  ;;  %v1095_v7 = vpop.f32.mrf.mxu2 }
 0x269   : > { %v1096_v8 = vadd.f32 %v1095_v7, %v928_v6 }
 0x26b   : > { %v1352_v44 = vrot.slane %v1096_v8, 4 }
 0x26c   : > { %v1505_v9 = vpop.f32.mrf.mxu3  ;;  %1341 = vrot.lane.b32.xlu0 %v1096_v8, %s3473_s18 }
 0x270   : > { %v1097_v10 = vpop.f32.mrf.mxu2 }
 0x274   : > { %v1522_v11 = vpop.f32.mrf.mxu3 }
 0x275   : > { %v1523_v13 = vadd.f32 %v1522_v11, %v891_v59 }
 0x277   : > { %v1552_v14 = vsel %vm1545_vm5, %v1523_v13, -inf }
 0x278   : > { %1553 = vmax.xlane.f32.xlu1 %v1552_v14 }
 0x27c   : > { %v1524_v15 = vpop.f32.mrf.mxu3 }
 0x280   : > { %1347 = vrot.lane.b32.xlu2 %v1096_v8, %s3472_s20 }
 0x291   : > { %1344 = vrot.lane.b32.xlu1 %v1096_v8, %s3471_s1 }
 0x2c5   : > { %v1557_v16 = vpop.xlane.xlu2 %1556 }
 0x2c6   : > { %v1561_v18 = vsub.f32 %v1542_v61, %v1557_v16 }
 0x2c8   : > { %v1568_v20 = vmul.f32 1.442695, %v1561_v18 }
 0x2cb   : > { %v1548_v17 = vpop.xlane.xlu0 %1547 }
 0x2cc   : > { %v1558_v57 = vsub.f32 %v1485_v1, %v1548_v17 }
 0x2ce   : > { %v1562_v19 = vmul.f32 1.442695, %v1558_v57 }
 0x2d0   : > { %3087 = vpow2.f32 %v1562_v19 }
 0x2d1   : > { %3089 = vpow2.f32 %v1568_v20 }
 0x2d6   : > { %v4034_v21 = vpop.eup %3087 }
 0x2d7   : > { %v1570_v22 = vsel %vm1545_vm5, %v4034_v21, 0.0  ;;  %v4038_v24 = vpop.eup %3089 }
 0x2d8   : > { %1571 = vadd.xlane.f32.xlu0 %v1570_v22  ;;  %v1579_v28 = vsel %vm1545_vm5, %v4038_v24, 0.0 }
 0x2db   : > { %v1551_v23 = vpop.xlane.xlu2 %1550 }
 0x2dc   : > { %v1559_v26 = vsub.f32 %v1504_v5, %v1551_v23 }
 0x2de   : > { %v1564_v27 = vmul.f32 1.442695, %v1559_v26  ;;  %v1342_v34 = vpop.permute.xlu0 %1341 }
 0x2df   : > { %v1364_v38 = vrot.slane %v1342_v34, 4 }
 0x2e0   : > { %3091 = vpow2.f32 %v1564_v27  ;;  %1580 = vadd.xlane.f32.xlu0 %v1579_v28 }
 0x2e3   : > { %v1348_v37 = vpop.permute.xlu2 %1347 }
 0x2e4   : > { %v1362_v39 = vrot.slane %v1348_v37, 4  ;;  %v1365_v40 = vsel %vm1110_vm3, %v1348_v37, %v1364_v38 }
 0x2e5   : > { %v1373_v42 = vperm.slane %v1365_v40, %v3914_v12 }
 0x2e6   : > { %v4042_v29 = vpop.eup %3091  ;;  %v1363_v41 = vsel %vm1110_vm3, %v1362_v39, %v1342_v34 }
 0x2e7   : > { %v1573_v30 = vsel %vm1545_vm5, %v4042_v29, 0.0  ;;  %v1369_v43 = vperm.slane %v1363_v41, %v3914_v12  ;;  %v1386_v45 = vrot.slane %v1373_v42, 4 }
 0x2e8   : > { %1574 = vadd.xlane.f32.xlu2 %v1573_v30 }
 0x2e9   : > { %v1374_v49 = vrot.slane %v1369_v43, 4 }
 0x2eb   : > { %v1554_v31 = vpop.xlane.xlu1 %1553 }
 0x2ec   : > { %v1560_v32 = vsub.f32 %v1523_v13, %v1554_v31 }
 0x2ee   : > { %v1566_v33 = vmul.f32 1.442695, %v1560_v32 }
 0x2f0   : > { %3093 = vpow2.f32 %v1566_v33 }
 0x2f6   : > { %v4046_v35 = vpop.eup %3093 }
 0x2f7   : > { %v1576_v36 = vsel %vm1545_vm5, %v4046_v35, 0.0 }
 0x2f8   : > { %1577 = vadd.xlane.f32.xlu1 %v1576_v36 }
 0x303   : > { %v1345_v46 = vpop.permute.xlu1 %1344 }
 0x304   : > { %v1350_v47 = vrot.slane %v1345_v46, 4  ;;  %v1353_v48 = vsel %vm1110_vm3, %v1345_v46, %v1352_v44 }
 0x305   : > { %v1361_v50 = vperm.slane %v1353_v48, %v3914_v12 }
 0x306   : > { %v1351_v51 = vsel %vm1110_vm3, %v1350_v47, %v1096_v8 }
 0x307   : > { %v1357_v52 = vperm.slane %v1351_v51, %v3914_v12  ;;  %v1387_v53 = vsel %vm1110_vm3, %v1386_v45, %v1361_v50  ;;  %v1388_v55 = vrot.slane %v1361_v50, 4 }
 0x308   : > { %v1393_v58 = vperm.slane %v1387_v53, %v3923_v25 }
 0x309   : > { %v1375_v59 = vsel %vm1110_vm3, %v1374_v49, %v1357_v52  ;;  %v1376_v60 = vrot.slane %v1357_v52, 4  ;;  %v1389_v61 = vsel %vm1110_vm3, %v1373_v42, %v1388_v55 }
 0x30a   : > { %v1381_v62 = vperm.slane %v1375_v59, %v3923_v25  ;;  %v1397_v63 = vperm.slane %v1389_v61, %v3923_v25  ;;  %v1402_v3 = vrot.slane %v1393_v58, 4 }
 0x30b   : > { %v1377_v1 = vsel %vm1110_vm3, %v1369_v43, %v1376_v60 }
 0x30c   : > { %v1385_v2 = vperm.slane %v1377_v1, %v3923_v25  ;;  %v1404_v56 = vrot.slane %v1397_v63, 4  ;;  %v1398_v4 = vrot.slane %v1381_v62, 4  ;;  %v1403_v10 = vsel %vm1110_vm3, 0.0, %v1402_v3 }
 0x30e   : > { %v1400_v5 = vrot.slane %v1385_v2, 4  ;;  %v1405_v0 = vsel %vm1110_vm3, 0.0, %v1404_v56  ;;  %v1417_v6 = vsel %vm1110_vm3, %v1404_v56, %v1393_v58  ;;  %v1399_v17 = vsel %vm1110_vm3, 0.0, %v1398_v4 }
 0x30f   : > { %v1421_v7 = vperm.slane %v1417_v6, %v3914_v12  ;;  %v1422_v8 = vrot.slane %v1405_v0, 4 }
 0x310   : > { %v1401_v9 = vsel %vm1110_vm3, 0.0, %v1400_v5  ;;  %v1406_v11 = vsel %vm1110_vm3, %v1400_v5, %v1381_v62 }
 0x311   : > { %v1411_v13 = vrot.slane %v1401_v9, 4  ;;  %v1423_v14 = vsel %vm1110_vm3, %v1422_v8, %v1403_v10  ;;  %v1442_v15 = vrot.slane %v1421_v7, 4  ;;  %v1410_v16 = vperm.slane %v1406_v11, %v3914_v12 }
 0x312   : > { %v1427_v57 = vperm.slane %v1423_v14, %v3914_v12 }
 0x313   : > { %v1412_v18 = vsel %vm1110_vm3, %v1411_v13, %v1399_v17  ;;  %v1430_v19 = vrot.slane %v1410_v16, 4 }
 0x314   : > { %v1416_v20 = vperm.slane %v1412_v18, %v3914_v12  ;;  %v1443_v22 = vsel %vm1110_vm3, %v1427_v57, %v1442_v15  ;;  %v1440_v23 = vrot.slane %v1427_v57, 4 }
 0x315   : > { %v1451_v26 = vperm.slane %v1443_v22, %v3923_v25 }
 0x316   : > { %v1431_v27 = vsel %vm1110_vm3, %v1416_v20, %v1430_v19  ;;  %v1428_v28 = vrot.slane %v1416_v20, 4  ;;  %v1441_v30 = vsel %vm1110_vm3, %v1440_v23, %v1421_v7 }
 0x317   : > { %v1439_v31 = vperm.slane %v1431_v27, %v3923_v25  ;;  %v1456_v32 = vrot.slane %v1451_v26, 4  ;;  %v1447_v33 = vperm.slane %v1441_v30, %v3923_v25 }
 0x318   : > { %v1429_v34 = vsel %vm1110_vm3, %v1428_v28, %v1410_v16 }
 0x319   : > { %v1457_v36 = vsel %vm1110_vm3, %v1456_v32, %v1439_v31  ;;  %v1435_v37 = vperm.slane %v1429_v34, %v3923_v25  ;;  %v1452_v38 = vrot.slane %v1447_v33, 4  ;;  %v1458_v39 = vrot.slane %v1439_v31, 4 }
 0x31a   : > { %v1596_v40 = vpack.c.bf16 %v1457_v36, %v1457_v36 }
 0x31b   : > { %v1453_v41 = vsel %vm1110_vm3, %v1452_v38, %v1435_v37  ;;  %v1454_v42 = vrot.slane %v1435_v37, 4  ;;  %v1459_v43 = vsel %vm1110_vm3, %v1451_v26, %v1458_v39 }
 0x31c   : > { %v1641_v44 = vsel %vm1601_vm6, %v1596_v40, 0  ;;  %v1594_v45 = vpack.c.bf16 %v1453_v41, %v1453_v41  ;;  %v1597_v46 = vpack.c.bf16 %v1459_v43, %v1459_v43 }
 0x31d   : > { %1650 = vmatpush.bf16.msrb.mxu3 %v1641_v44  ;;  %v1455_v47 = vsel %vm1110_vm3, %v1447_v33, %v1454_v42 }
 0x31e   : > { %v1603_v48 = vsel %vm1601_vm6, %v1594_v45, 0  ;;  %v1660_v49 = vsel %vm1601_vm6, %v1597_v46, 0  ;;  %v1595_v50 = vpack.c.bf16 %v1455_v47, %v1455_v47 }
 0x31f   : > { %1612 = vmatpush.bf16.msrb.mxu2 %v1603_v48  ;;  %1669 = vmatpush.bf16.msra.mxu0 %v1660_v49 }
 0x320   : > { %v1622_v51 = vsel %vm1601_vm6, %v1595_v50, 0 }
 0x323   : > { %1631 = vmatpush.bf16.msra.mxu2 %v1622_v51 }
 0x34b   : > { %v1572_v52 = vpop.xlane.xlu0 %1571 }
 0x34c   : > { %3095 = vrcp.f32 %v1572_v52 }
 0x352   : > { %v3096_v53 = vpop.eup %3095 }
 0x353   : > { %v1586_v55 = vmul.f32 %v3096_v53, %v4034_v21  ;;  %v1581_v58 = vpop.xlane.xlu0 %1580 }
 0x354   : > { %3097 = vrcp.f32 %v1581_v58 }
 0x355   : > { %v1590_v59 = vpack.c.bf16 %v1586_v55, %v1586_v55 }
 0x357   : > { %2693 = vmatmul.msk.bf16.vlgmr.msrb.gmra.mxu2 %vm1545_vm5, %v1590_v59 }
 0x35a   : > { %v3098_v60 = vpop.eup %3097 }
 0x35b   : > { %v1589_v61 = vmul.f32 %v3098_v60, %v4038_v24  ;;  %v1575_v62 = vpop.xlane.xlu2 %1574 }
 0x35c   : > { %3099 = vrcp.f32 %v1575_v62 }
 0x35d   : > { %v1593_v63 = vpack.c.bf16 %v1589_v61, %v1589_v61 }
 0x35f   : > { %2696 = vmatmul.msk.bf16.vlgmr.msra.gmra.mxu0 %vm1545_vm5, %v1593_v63 }
 0x362   : > { %v3100_v1 = vpop.eup %3099 }
 0x363   : > { %v1587_v2 = vmul.f32 %v3100_v1, %v4042_v29 }
 0x365   : > { %v1591_v3 = vpack.c.bf16 %v1587_v2, %v1587_v2 }
 0x367   : > { %2694 = vmatmul.msk.bf16.vlgmr.msra.gmra.mxu2 %vm1545_vm5, %v1591_v3 }
 0x36b   : > { %v1578_v21 = vpop.xlane.xlu1 %1577 }
 0x36c   : > { %3101 = vrcp.f32 %v1578_v21 }
 0x372   : > { %v3102_v56 = vpop.eup %3101 }
 0x373   : > { %v1588_v4 = vmul.f32 %v3102_v56, %v4046_v35 }
 0x375   : > { %v1592_v5 = vpack.c.bf16 %v1588_v4, %v1588_v4 }
 0x377   : > { %2695 = vmatmul.msk.bf16.vlgmr.msrb.gmra.mxu3 %vm1545_vm5, %v1592_v5 }
 0x3da   : > { %v1614_v24 = vpop.f32.mrf.mxu2 }
 0x3db   : > { %v1677_v15 = vrot.slane %v1614_v24, 4 }
 0x3dc   : > { %v1671_v0 = vpop.f32.mrf.mxu0 }
 0x3dd   : > { %v1687_v11 = vrot.slane %v1671_v0, 4 }
 0x3e2   : > { %v1616_v6 = vpop.f32.mrf.mxu2 }
 0x3e4   : > { %v1673_v7 = vpop.f32.mrf.mxu0 }
 0x3ea   : > { %v1633_v8 = vpop.f32.mrf.mxu2 }
 0x3eb   : > { %v1689_v9 = vrot.slane %v1633_v8, 4  ;;  %v1688_v13 = vsel %vm1110_vm3, %v1687_v11, %v1633_v8 }
 0x3ec   : > { %v1694_v35 = vperm.slane %v1688_v13, %v3914_v12  ;;  %v2894_v13 = vld [vmem:[%s3805_s16 + $0x28] sm:$0xff] }
 0x3ed   : > { %v1690_v29 = vsel %vm1110_vm3, %v1671_v0, %v1689_v9 }
 0x3ee   : > { %v1698_v14 = vperm.slane %v1690_v29, %v3914_v12  ;;  %v1699_v22 = vrot.slane %v1694_v35, 4  ;;  %v2896_v29 = vld [vmem:[%s3805_s16 + $0x38] sm:$0xff] }
 0x3ef   : > { %1871 = vmatpush.bf16.msrb.mxu1 %v2896_v29  ;;  %v2901_v29 = vld [vmem:[%s3813_s11 + $0x24] sm:$0xf] }
 0x3f0   : > { %v1711_v18 = vrot.slane %v1698_v14, 4 }
 0x3f2   : > { %v1635_v10 = vpop.f32.mrf.mxu2 }
 0x3fa   : > { %v1652_v16 = vpop.f32.mrf.mxu3 }
 0x3fb   : > { %v1675_v17 = vrot.slane %v1652_v16, 4  ;;  %v1678_v57 = vsel %vm1110_vm3, %v1652_v16, %v1677_v15  ;;  %v2892_v15 = vld [vmem:[%s3805_s16 + $0x18] sm:$0xff]  ;;  %v2890_v16 = vld [vmem:[%s3805_s16 + $0x8] sm:$0xff] }
 0x3fc   : > { %v1686_v19 = vperm.slane %v1678_v57, %v3914_v12 }
 0x3fd   : > { %v1676_v20 = vsel %vm1110_vm3, %v1675_v17, %v1614_v24  ;;  %v2889_v17 = vld [vmem:[%s3805_s16] sm:$0xff] }
 0x3fe   : > { %v1682_v23 = vperm.slane %v1676_v20, %v3914_v12  ;;  %v1712_v26 = vsel %vm1110_vm3, %v1711_v18, %v1686_v19  ;;  %v1713_v27 = vrot.slane %v1686_v19, 4 }
 0x3ff   : > { %v1718_v28 = vperm.slane %v1712_v26, %v3923_v25 }
 0x400   : > { %v1700_v30 = vsel %vm1110_vm3, %v1699_v22, %v1682_v23  ;;  %v1701_v31 = vrot.slane %v1682_v23, 4  ;;  %v1714_v32 = vsel %vm1110_vm3, %v1698_v14, %v1713_v27  ;;  %v2893_v14 = vld [vmem:[%s3805_s16 + $0x20] sm:$0xff]  ;;  %v3081_v27 = vld [vmem:[%s4408_s27] ss:$0 sm:$0xff] }
 0x401   : > { %v1706_v33 = vperm.slane %v1700_v30, %v3923_v25  ;;  %v1722_v34 = vperm.slane %v1714_v32, %v3923_v25  ;;  %v1727_v39 = vrot.slane %v1718_v28, 4 }
 0x402   : > { %v1702_v36 = vsel %vm1110_vm3, %v1694_v35, %v1701_v31  ;;  %v1654_v37 = vpop.f32.mrf.mxu3  ;;  %v2891_v35 = vld [vmem:[%s3805_s16 + $0x10] sm:$0xff] }
 0x403   : > { %v1710_v38 = vperm.slane %v1702_v36, %v3923_v25  ;;  %v1729_v40 = vrot.slane %v1722_v34, 4  ;;  %v1723_v41 = vrot.slane %v1706_v33, 4  ;;  %v1728_v48 = vsel %vm1110_vm3, 0.0, %v1727_v39 }
 0x405   : > { %v1725_v42 = vrot.slane %v1710_v38, 4  ;;  %v1730_v43 = vsel %vm1110_vm3, 0.0, %v1729_v40  ;;  %v1742_v44 = vsel %vm1110_vm3, %v1729_v40, %v1718_v28  ;;  %v1724_v55 = vsel %vm1110_vm3, 0.0, %v1723_v41 }
 0x406   : > { %v1746_v45 = vperm.slane %v1742_v44, %v3914_v12  ;;  %v1747_v46 = vrot.slane %v1730_v43, 4  ;;  %v2787_v44 = vld [vmem:[%s3813_s11 + $0x70] sm:$0xf] }
 0x407   : > { %v1726_v47 = vsel %vm1110_vm3, 0.0, %v1725_v42  ;;  %v1731_v49 = vsel %vm1110_vm3, %v1725_v42, %v1706_v33  ;;  %v3476_v33 = vmov 128.0  }
 0x408   : > { %v1748_v50 = vsel %vm1110_vm3, %v1747_v46, %v1728_v48  ;;  %v1735_v51 = vperm.slane %v1731_v49, %v3914_v12  ;;  %v1736_v52 = vrot.slane %v1726_v47, 4  ;;  %v1767_v53 = vrot.slane %v1746_v45, 4  ;;  %v2911_v46 = vld [vmem:[%s3813_s11 + $0x74] sm:$0xf]  ;;  %v2789_v48 = vld [vmem:[%s3813_s11 + $0x78] sm:$0xf0] }
 0x409   : > { %v1752_v58 = vperm.slane %v1748_v50, %v3914_v12  ;;  %3103 = vrcp.f32 %v3476_v33  ;;  %v2792_v49 = vor.u32 %v2911_v46, %v2789_v48  ;;  %v2779_v50 = vld [vmem:[%s3813_s11 + $0x60] sm:$0xf] }
 0x40a   : > { %v1737_v59 = vsel %vm1110_vm3, %v1736_v52, %v1724_v55  ;;  %v1755_v60 = vrot.slane %v1735_v51, 4  ;;  %v2909_v52 = vld [vmem:[%s3813_s11 + $0x64] sm:$0xf]  ;;  %v2781_v55 = vld [vmem:[%s3813_s11 + $0x68] sm:$0xf0] }
 0x40b   : > { %v1741_v61 = vperm.slane %v1737_v59, %v3914_v12  ;;  %v1768_v62 = vsel %vm1110_vm3, %v1752_v58, %v1767_v53  ;;  %v1765_v63 = vrot.slane %v1752_v58, 4  ;;  %2041 = vmatpush.bf16.msra.mxu3 %v2792_v49  ;;  %v2771_v58 = vld [vmem:[%s3813_s11 + $0x50] sm:$0xf]  ;;  %v2908_v59 = vld [vmem:[%s3813_s11 + $0x54] sm:$0xf0] }
 0x40c   : > { %v1776_v1 = vperm.slane %v1768_v62, %v3923_v25  ;;  %v2773_v62 = vld [vmem:[%s3813_s11 + $0x58] sm:$0xf0] }
 0x40d   : > { %v1756_v2 = vsel %vm1110_vm3, %v1741_v61, %v1755_v60  ;;  %v1753_v3 = vrot.slane %v1741_v61, 4  ;;  %v1766_v21 = vsel %vm1110_vm3, %v1765_v63, %v1746_v45  ;;  %v2912_v45 = vld [vmem:[%s3813_s11 + $0x74] sm:$0xf0]  ;;  %v2784_v60 = vor.u32 %v2909_v52, %v2781_v55  ;;  %v2907_v61 = vld [vmem:[%s3813_s11 + $0x54] sm:$0xf]  ;;  %v2918_v55 = vld [vmem:[%s3855_s26 + $0x28] sm:$0xff] }
 0x40e   : > { %v1764_v56 = vperm.slane %v1756_v2, %v3923_v25  ;;  %v1781_v4 = vrot.slane %v1776_v1, 4  ;;  %v1772_v5 = vperm.slane %v1766_v21, %v3923_v25  ;;  %v2788_v47 = vor.u32 %v2912_v45, %v2787_v44  ;;  %v2763_v2 = vld [vmem:[%s3813_s11 + $0x40] sm:$0xf]  ;;  %v2905_v21 = vld [vmem:[%s3813_s11 + $0x44] sm:$0xf] }
 0x40f   : > { %v1754_v24 = vsel %vm1110_vm3, %v1753_v3, %v1735_v51  ;;  %v3104_v34 = vpop.eup %3103  ;;  %v2910_v51 = vld [vmem:[%s3813_s11 + $0x64] sm:$0xf0]  ;;  %v2772_v63 = vor.u32 %v2908_v59, %v2771_v58  ;;  %2042 = vmatpush.bf16.msra.mxu3 %v2784_v60  ;;  %v2925_v59 = vld [vmem:[%s3855_s26 + $0x60] sm:$0xff]  ;;  %v2916_v60 = vld [vmem:[%s3855_s26 + $0x18] sm:$0xff] }
 0x410   : > { %v1782_v12 = vsel %vm1110_vm3, %v1781_v4, %v1764_v56  ;;  %v1783_v0 = vrot.slane %v1764_v56, 4  ;;  %v1760_v6 = vperm.slane %v1754_v24, %v3923_v25  ;;  %v1777_v7 = vrot.slane %v1772_v5, 4  ;;  %v2895_v25 = vld [vmem:[%s3805_s16 + $0x30] sm:$0xff]  ;;  %2028 = vmatpush.bf16.msrb.mxu2 %v2788_v47  ;;  %v2906_v3 = vld [vmem:[%s3813_s11 + $0x44] sm:$0xf0]  ;;  %s4409_s16 = sld [smem:[#allocation39_spill]] }
 0x411   : > { %1790 = vrot.lane.b32.xlu0 %v1782_v12, %s3471_s1  ;;  %1872 = vmatpush.bf16.msrb.mxu1 %v2895_v25  ;;  %v1890_v36 = vmul.f32 128.0, %v3104_v34  ;;  %vm1894_vm9 = vweird.f32 %v3104_v34  ;;  %v2780_v53 = vor.u32 %v2910_v51, %v2779_v50  ;;  %v2765_v56 = vld [vmem:[%s3813_s11 + $0x48] sm:$0xf0]  ;;  %v2764_v4 = vor.u32 %v2906_v3, %v2763_v2  ;;  %v2755_v24 = vld [vmem:[%s3813_s11 + $0x30] sm:$0xf]  ;;  %v2913_v3 = vld [vmem:[%s3855_s26] sm:$0xff] }
 0x412   : > { %v1784_v8 = vsel %vm1110_vm3, %v1776_v1, %v1783_v0  ;;  %v1779_v9 = vrot.slane %v1760_v6, 4  ;;  %v1778_v10 = vsel %vm1110_vm3, %v1777_v7, %v1760_v6  ;;  %v2776_v1 = vor.u32 %v2907_v61, %v2773_v62  ;;  %v2904_v12 = vld [vmem:[%s3813_s11 + $0x34] sm:$0xf0]  ;;  %v2903_v0 = vld [vmem:[%s3813_s11 + $0x34] sm:$0xf]  ;;  %v2926_v58 = vld [vmem:[%s3855_s26 + $0x68] sm:$0xff] }
 0x413   : > { %1794 = vrot.lane.b32.xlu2 %v1784_v8, %s3473_s18  ;;  %v1891_v37 = vsub.f32 1.0, %v1890_v36  ;;  %v2757_v6 = vld [vmem:[%s3813_s11 + $0x38] sm:$0xf0]  ;;  %v2756_v7 = vor.u32 %v2904_v12, %v2755_v24  ;;  %v2749_v25 = vld [vmem:[%s3813_s11 + $0x28] sm:$0xf0]  ;;  %v2915_v62 = vld [vmem:[%s3855_s26 + $0x10] sm:$0xff] }
 0x414   : > { %v1780_v11 = vsel %vm1110_vm3, %v1772_v5, %v1779_v9  ;;  %2029 = vmatpush.bf16.msrb.mxu2 %v2780_v53  ;;  %2043 = vmatpush.bf16.msra.mxu3 %v2776_v1  ;;  %v2768_v5 = vor.u32 %v2905_v21, %v2765_v56  ;;  %v2760_v8 = vor.u32 %v2903_v0, %v2757_v6  ;;  %v2747_v9 = vld [vmem:[%s3813_s11 + $0x20] sm:$0xf]  ;;  %v3082_v47 = vld [vmem:[%s860_s0] ss:$0 sm:$0xff]  ;;  %v2924_v61 = vld [vmem:[%s3855_s26 + $0x58] sm:$0xff] }
 0x415   : > { %1786 = vrot.lane.b32.xlu1 %v1780_v11, %s3472_s20  ;;  %1873 = vmatpush.bf16.msrb.mxu1 %v2894_v13  ;;  %v1892_v38 = vmul.f32 %v3104_v34, %v1891_v37  ;;  %v2914_v1 = vld [vmem:[%s3855_s26 + $0x8] sm:$0xff]  ;;  %v2921_v21 = vld [vmem:[%s3855_s26 + $0x40] sm:$0xff] }
 0x416   : > { %s4411_s8 = scalar_lea.vmem [#allocation12], %s4409_s16  ;;  %v2922_v2 = vld [vmem:[%s3855_s26 + $0x48] sm:$0xff]  ;;  %v1942_v56 = vld [vmem:[%s3841_s24] sm:$0x3] }
 0x417   : > { %v1893_v39 = vadd.f32 %v3104_v34, %v1892_v38  ;;  %v3083_v49 = vld [vmem:[%s4411_s8] ss:$0 sm:$0xff] }
 0x418   : > { %2030 = vmatpush.bf16.msrb.mxu2 %v2772_v63  ;;  %2044 = vmatpush.bf16.msra.mxu3 %v2768_v5  ;;  %v2923_v63 = vld [vmem:[%s3855_s26 + $0x50] sm:$0xff]  ;;  %v1945_v5 = vperm.slane %v1942_v56, 1 }
 0x419   : > { %1874 = vmatpush.bf16.msrb.mxu1 %v2893_v14  ;;  %v4160_v40 = vsel %vm1894_vm9, %v3104_v34, %v1893_v39 }
 0x41c   : > { %2031 = vmatpush.bf16.msrb.mxu2 %v2764_v4  ;;  %2045 = vmatpush.bf16.msra.mxu3 %v2760_v8  ;;  %v1944_v4 = vperm.slane %v1942_v56, 0 }
 0x41d   : > { %1875 = vmatpush.bf16.msrb.mxu1 %v2892_v15  ;;  %v2752_v15 = vor.u32 %v2901_v29, %v2749_v25 }
 0x420   : > { %2032 = vmatpush.bf16.msrb.mxu2 %v2756_v7  ;;  %2046 = vmatpush.bf16.msra.mxu3 %v2752_v15 }
 0x421   : > { %1876 = vmatpush.bf16.msrb.mxu1 %v2891_v35  ;;  %v2739_v35 = vld [vmem:[%s3813_s11 + $0x10] sm:$0xf] }
 0x425   : > { %1877 = vmatpush.bf16.msrb.mxu1 %v2890_v16  ;;  %v2900_v16 = vld [vmem:[%s3813_s11 + $0x14] sm:$0xf0] }
 0x429   : > { %1878 = vmatpush.bf16.msrb.mxu1 %v2889_v17  ;;  %v2899_v17 = vld [vmem:[%s3813_s11 + $0x14] sm:$0xf] }
 0x46d   : > { %v1795_v20 = vpop.permute.xlu2 %1794 }
 0x483   : > { %v1791_v18 = vpop.permute.xlu0 %1790 }
 0x487   : > { %v1787_v57 = vpop.permute.xlu1 %1786 }
 0x488   : > { %v1797_v19 = vsel %vm1468_vm4, %v1778_v10, %v1787_v57  ;;  %v2902_v10 = vld [vmem:[%s3813_s11 + $0x24] sm:$0xf0]  ;;  %v2741_v57 = vld [vmem:[%s3813_s11 + $0x18] sm:$0xf0] }
 0x489   : > { %v1799_v22 = vsel %vm1798_vm7, %v1797_v19, %v1791_v18  ;;  %v2748_v14 = vor.u32 %v2902_v10, %v2747_v9  ;;  %v2740_v18 = vor.u32 %v2900_v16, %v2739_v35  ;;  %v2731_v19 = vld [vmem:[%s3813_s11] sm:$0xf] }
 0x48a   : > { %v1801_v23 = vsel %vm1800_vm8, %v1799_v22, %v1795_v20  ;;  %v2744_v20 = vor.u32 %v2899_v17, %v2741_v57  ;;  %v2898_v22 = vld [vmem:[%s3813_s11 + $0x4] sm:$0xf0] }
 0x48b   : > { %v1802_v26 = vpack.c.bf16 %v1801_v23, %v1801_v23  ;;  %2033 = vmatpush.bf16.msrb.mxu2 %v2748_v14  ;;  %v2920_v23 = vld [vmem:[%s3855_s26 + $0x38] sm:$0xff]  ;;  %v2732_v34 = vor.u32 %v2898_v22, %v2731_v19 }
 0x48c   : > { %2206 = vmatpush.bf16.msrb.mxu0 %v2920_v23  ;;  %2047 = vmatpush.bf16.msra.mxu3 %v2744_v20 }
 0x48d   : > { %1879 = vmatmul.bf16.vlgmr.msrb.gmra.mxu1 %v1802_v26  ;;  %v2928_v26 = vld [vmem:[%s3855_s26 + $0x78] sm:$0xff] }
 0x48e   : > { %2219 = vmatpush.bf16.msra.mxu1 %v2928_v26 }
 0x48f   : > { %2034 = vmatpush.bf16.msrb.mxu2 %v2740_v18 }
 0x493   : > { %2035 = vmatpush.bf16.msrb.mxu2 %v2732_v34 }
 0x50a   : > { %v1880_v28 = vpop.f32.mrf.mxu1 }
 0x50b   : > { %v1881_v30 = vadd.f32 %v3081_v27, %v1880_v28  ;;  %v2897_v27 = vld [vmem:[%s3813_s11 + $0x4] sm:$0xf]  ;;  %v2733_v28 = vld [vmem:[%s3813_s11 + $0x8] sm:$0xf0] }
 0x50c   : > { %v2736_v36 = vor.u32 %v2897_v27, %v2733_v28 }
 0x50d   : > { %v1884_v31 = vadd.f32 %v1881_v30, %v3894_v54 }
 0x50e   : > { %2048 = vmatpush.bf16.msra.mxu3 %v2736_v36 }
 0x50f   : > { %1887 = vadd.xlane.f32.xlu0 %v1884_v31 }
 0x512   : > { %v1882_v32 = vpop.f32.mrf.mxu1 }
 0x513   : > { %v2927_v32 = vld [vmem:[%s3855_s26 + $0x70] sm:$0xff] }
 0x514   : > { %2220 = vmatpush.bf16.msra.mxu1 %v2927_v32 }
 0x518   : > { %2221 = vmatpush.bf16.msra.mxu1 %v2926_v58 }
 0x51c   : > { %2222 = vmatpush.bf16.msra.mxu1 %v2925_v59 }
 0x520   : > { %2223 = vmatpush.bf16.msra.mxu1 %v2924_v61 }
 0x524   : > { %2224 = vmatpush.bf16.msra.mxu1 %v2923_v63 }
 0x528   : > { %2225 = vmatpush.bf16.msra.mxu1 %v2922_v2 }
 0x52c   : > { %2226 = vmatpush.bf16.msra.mxu1 %v2921_v21 }
 0x582   : > { %v1888_v54 = vpop.xlane.xlu0 %1887 }
 0x583   : > { %v1896_v41 = vmul.f32 %v4160_v40, %v1888_v54 }
 0x585   : > { %v4163_v42 = vsub.f32 %v1884_v31, %v1896_v41  ;;  %v2919_v31 = vld [vmem:[%s3855_s26 + $0x30] sm:$0xff] }
 0x586   : > { %2207 = vmatpush.bf16.msrb.mxu0 %v2919_v31 }
 0x587   : > { %v1898_v43 = vmul.f32 %v4163_v42, %v4163_v42  ;;  %v1919_v48 = vmul.f32 %v3082_v47, %v4163_v42  ;;  %v2917_v42 = vld [vmem:[%s3855_s26 + $0x20] sm:$0xff] }
 0x589   : > { %1899 = vadd.xlane.f32.xlu1 %v1898_v43 }
 0x58a   : > { %2208 = vmatpush.bf16.msrb.mxu0 %v2918_v55 }
 0x58e   : > { %2209 = vmatpush.bf16.msrb.mxu0 %v2917_v42  ;;  %v3085_v42 = vld [vmem:[%s870_s14] ss:$0 sm:$0xff] }
 0x592   : > { %2210 = vmatpush.bf16.msrb.mxu0 %v2916_v60  ;;  %v3086_v60 = vld [vmem:[%s873_s25] ss:$0 sm:$0xff] }
 0x596   : > { %2211 = vmatpush.bf16.msrb.mxu0 %v2915_v62 }
 0x59a   : > { %2212 = vmatpush.bf16.msrb.mxu0 %v2914_v1 }
 0x59e   : > { %2213 = vmatpush.bf16.msrb.mxu0 %v2913_v3 }
 0x5fc   : > { %v1900_v11 = vpop.xlane.xlu1 %1899 }
 0x5fd   : > { %v1901_v13 = vmul.f32 0.007874016, %v1900_v11 }
 0x5ff   : > { %3105 = vrsqrt.f32 %v1901_v13  ;;  %vm1909_vm10 = vcmp.eq.f32.partialorder %v1901_v13, inf  ;;  %v1912_v43 = vand.u32 2147483648, %v1901_v13  ;;  %vm1911_vm11 = vcmp.eq.f32.partialorder %v1901_v13, 0.0 }
 0x605   : > { %v3106_v30 = vpop.eup %3105 }
 0x606   : > { %v1903_v33 = vmul.f32 %v3106_v30, %v1901_v13 }
 0x608   : > { %v1904_v37 = vmul.f32 %v3106_v30, %v1903_v33 }
 0x60a   : > { %v1905_v38 = vmul.f32 0.5, %v1904_v37 }
 0x60c   : > { %v1906_v39 = vsub.f32 1.5, %v1905_v38 }
 0x60e   : > { %v1907_v54 = vmul.f32 %v3106_v30, %v1906_v39  ;;  %v3084_v30 = vld [vmem:[%s867_s19] ss:$0 sm:$0xff] }
 0x610   : > { %v1908_v41 = vmul.f32 %v1907_v54, %v1901_v13 }
 0x612   : > { %v1910_v44 = vsel %vm1909_vm10, %v1901_v13, %v1908_v41 }
 0x613   : > { %v1913_v45 = vsel %vm1911_vm11, %v1912_v43, %v1910_v44 }
 0x614   : > { %v1914_v46 = vadd.f32 1e-06, %v1913_v45 }
 0x616   : > { %3107 = vrcp.f32 %v1914_v46 }
 0x61c   : > { %v3108_v50 = vpop.eup %3107 }
 0x61d   : > { %v1920_v51 = vmul.f32 %v3108_v50, %v1919_v48 }
 0x61f   : > { %v4211_v52 = vadd.f32 %v3083_v49, %v1920_v51 }
 0x621   : > { %v1925_v53 = vpack.c.bf16 %v4211_v52, %v4211_v52 }
 0x623   : > { %2036 = vmatmul.bf16.vlgmr.msrb.gmra.mxu2 %v1925_v53  ;;  %2049 = vmatmul.bf16.vlgmr.msra.gmra.mxu3 %v1925_v53 }
 0x6a6   : > { %v2037_v24 = vpop.f32.mrf.mxu2  ;;  %v2050_v12 = vpop.f32.mrf.mxu3 }
 0x6a7   : > { %v2038_v0 = vadd.f32 %v2037_v24, %v1944_v4  ;;  %v2051_v6 = vadd.f32 %v2050_v12, %v1945_v5 }
 0x6a9   : > { %v2056_v7 = vmul.f32 0.044715, %v2038_v0  ;;  %v2057_v8 = vmul.f32 0.044715, %v2051_v6  ;;  %v2054_v18 = vmul.f32 0.5, %v2038_v0  ;;  %v2055_v20 = vmul.f32 0.5, %v2051_v6 }
 0x6ab   : > { %v2058_v9 = vmul.f32 %v2056_v7, %v2038_v0  ;;  %v2059_v10 = vmul.f32 %v2057_v8, %v2051_v6 }
 0x6ad   : > { %v2060_v11 = vmul.f32 %v2058_v9, %v2038_v0  ;;  %v2061_v29 = vmul.f32 %v2059_v10, %v2051_v6 }
 0x6ae   : > { %v2039_v25 = vpop.f32.mrf.mxu2  ;;  %v2052_v13 = vpop.f32.mrf.mxu3 }
 0x6af   : > { %v2062_v14 = vadd.f32 %v2060_v11, %v2038_v0  ;;  %v2063_v15 = vadd.f32 %v2061_v29, %v2051_v6 }
 0x6b1   : > { %v2064_v35 = vmul.f32 0.7978846, %v2062_v14  ;;  %v2065_v16 = vmul.f32 0.7978846, %v2063_v15 }
 0x6b3   : > { %3109 = vtanh.f32 %v2064_v35 }
 0x6b4   : > { %3111 = vtanh.f32 %v2065_v16 }
 0x6b9   : > { %v3110_v17 = vpop.eup %3109 }
 0x6ba   : > { %v3112_v57 = vpop.eup %3111  ;;  %v2068_v19 = vadd.f32 1.0, %v3110_v17 }
 0x6bb   : > { %v2069_v22 = vadd.f32 1.0, %v3112_v57 }
 0x6bc   : > { %v2070_v23 = vmul.f32 %v2068_v19, %v2054_v18 }
 0x6bd   : > { %v2071_v26 = vmul.f32 %v2069_v22, %v2055_v20 }
 0x6be   : > { %v2072_v27 = vpack.c.bf16 %v2070_v23, %v2070_v23 }
 0x6bf   : > { %v2073_v28 = vpack.c.bf16 %v2071_v26, %v2071_v26 }
 0x6c0   : > { %2214 = vmatmul.bf16.vlgmr.msrb.gmra.mxu0 %v2072_v27 }
 0x6c1   : > { %2227 = vmatmul.bf16.vlgmr.msra.gmra.mxu1 %v2073_v28 }
 0x73d   : > { %v2215_v31 = vpop.f32.mrf.mxu0 }
 0x73e   : > { %v2216_v32 = vadd.f32 %v3084_v30, %v2215_v31  ;;  %v2228_v33 = vpop.f32.mrf.mxu1 }
 0x740   : > { %v2229_v34 = vadd.f32 %v2228_v33, %v2216_v32 }
 0x742   : > { %v2232_v36 = vadd.f32 %v2229_v34, %v4211_v52 }
 0x744   : > { %2235 = vadd.xlane.f32.xlu2 %v2232_v36 }
 0x745   : > { %v2217_v37 = vpop.f32.mrf.mxu0 }
 0x746   : > { %v2230_v38 = vpop.f32.mrf.mxu1 }
 0x7b7   : > { %v2236_v39 = vpop.xlane.xlu2 %2235 }
 0x7b8   : > { %v2237_v54 = vmul.f32 %v2236_v39, %v4160_v40 }
 0x7ba   : > { %v2238_v41 = vsub.f32 %v2232_v36, %v2237_v54 }
 0x7bc   : > { %v2239_v43 = vmul.f32 %v2238_v41, %v2238_v41  ;;  %v2260_v59 = vmul.f32 %v3085_v42, %v2238_v41 }
 0x7be   : > { %2240 = vadd.xlane.f32.xlu0 %v2239_v43 }
 0x831   : > { %v2241_v44 = vpop.xlane.xlu0 %2240 }
 0x832   : > { %v2242_v45 = vmul.f32 0.007874016, %v2241_v44 }
 0x834   : > { %3113 = vrsqrt.f32 %v2242_v45  ;;  %vm2250_vm12 = vcmp.eq.f32.partialorder %v2242_v45, inf  ;;  %v2253_v53 = vand.u32 2147483648, %v2242_v45  ;;  %vm2252_vm13 = vcmp.eq.f32.partialorder %v2242_v45, 0.0 }
 0x83a   : > { %v3114_v46 = vpop.eup %3113 }
 0x83b   : > { %v2244_v47 = vmul.f32 %v3114_v46, %v2242_v45 }
 0x83d   : > { %v2245_v48 = vmul.f32 %v3114_v46, %v2244_v47 }
 0x83f   : > { %v2246_v49 = vmul.f32 0.5, %v2245_v48 }
 0x841   : > { %v2247_v50 = vsub.f32 1.5, %v2246_v49 }
 0x843   : > { %v2248_v51 = vmul.f32 %v3114_v46, %v2247_v50 }
 0x845   : > { %v2249_v52 = vmul.f32 %v2248_v51, %v2242_v45 }
 0x847   : > { %v2251_v55 = vsel %vm2250_vm12, %v2242_v45, %v2249_v52 }
 0x848   : > { %v2254_v40 = vsel %vm2252_vm13, %v2253_v53, %v2251_v55 }
 0x849   : > { %v2255_v58 = vadd.f32 1e-06, %v2254_v40 }
 0x84b   : > { %3115 = vrcp.f32 %v2255_v58 }
 0x851   : > { %v3116_v61 = vpop.eup %3115 }
 0x852   : > { %v2261_v62 = vmul.f32 %v3116_v61, %v2260_v59  ;;  %2270 = sbr.rel (%p2857_p11) target bundleno = 2136 (0x858), region = 116 }
 0x854   : > { %v2265_v63 = vadd.f32 %v3086_v60, %v2261_v62 }
 0x856   : > { %2266 = vst [vmem:[#allocation2] sm:$0xff] %v2265_v63 }
 0x857   : > { %2271 = vst [vmem:[%s3857_s29] sm:$0xff] %v2265_v63 }
 0x858 PF: > { %s4416_s5 = sld [smem:[#allocation28_spill]]  ;;  %s2285_s25 = sshll.u32 %s3857_s29, 4  ;;  %s2286_s25 = int_to_ptr.vmem [resolvable:$true] %s2285_s25 }
 0x859   : > { %s4418_s1 = sld [smem:[#allocation54_spill]]  ;;  %s2273_s18 = scalar_lea.sflag [#allocation6], %s3782_s2 }
 0x85e   : > { %s2859_s15 = sshll.u32 %s4416_s5, 3 }
 0x85f   : > { %s4419_s28 = smov %s4418_s1  ;;  %s2283_s22 = scalar_lea.hbm %s4418_s1, %s2859_s15 }
 0x860   : > { %s2287_s20 = sshll.u32 %s2283_s22, 4  ;;  %s3347_s11 = scalar_lea.hbm %s4419_s28, 16  ;;  %s2288_s20 = int_to_ptr.hbm [resolvable:$true] %s2287_s20 }
 0x861   : > { %s3341_s12 = sshra.s32 %s2288_s20, 4  ;;  %s3342_s12 = int_to_ptr.hbm [resolvable:$true] %s3341_s12 }
 0x862   : > { %s3343_s23 = scalar_lea.hbm %s3342_s12, 8  ;;  %p3348_p5 = scmp.lt.s32.totalorder %s3342_s12, %s4419_s28 }
 0x863   : > { %p3344_p12 = scmp.ne.s32.totalorder %s3342_s12, %s3343_s23  ;;  %p3349_p6 = scmp.lt.s32.totalorder %s3347_s11, %s3343_s23 }
 0x865   : > { %p3345_p1 = pnand %p3344_p12, %p3732_p13  ;;  %p3350_p8 = por %p3349_p6, %p3348_p5 }
 0x867   : > { %p3346_p0 = pneg %p3345_p1 }
 0x869   : > { %p3351_p9 = pnand %p3350_p8, %p3346_p0 }
 0x86b   : > { %3354 = shalt.err (!%p3351_p9)
}
 0x86c   : > { %2949 = dma.vmem_to_hbm [thread:$0]  (%p3732_p13), %s2286_s25, 128, %s2288_s20, %s2273_s18  }
 0x86d PF: > { %s4420_s2 = sld [smem:[#allocation31_spill]] }
 0x86e   : > { %s4421_s29 = sld [smem:[#allocation24_spill]] }
 0x873   : > { %p2978_p2 = scmp.ge.s32.totalorder %s4420_s2, 2 }
 0x874   : > { %s2299_s24 = sand.u32 1, %s4421_s29  }
 0x875   : > { %p2974_p4 = pnand %p2978_p2, %p3739_p3  ;;  %s2300_s13 = scalar_lea.sflag [#allocation6], %s2299_s24 }
 0x877   : > { %p2975_p7 = pneg %p2974_p4 }
 0x879   : > { %3416 = dma.done.wait (%p2975_p7), %s2300_s13, 128  }
 0x87a   : > { %3418 = vsyncadd (%p2975_p7), %s2300_s13, 4294967168  ;;  %s40_s26 = sadd.s32 1, %s4420_s2   ;;  %s4423_s17 = sld [smem:[#allocation22_spill]] }
 0x87b   : > { %p37_p10 = scmp.ge.s32.totalorder %s40_s26, 6   ;;  %s4424_s1 = sld [smem:[#allocation23_spill]] }
 0x87c   : > { %s4425_s18 = sld [smem:[#allocation34_spill]] }
 0x87d   : > { %s4426_s19 = sld [smem:[#allocation25_spill]] }
 0x87e   : > { %s4427_s20 = sld [smem:[#allocation26_spill]] }
 0x87f   : > { %s4428_s21 = sld [smem:[#allocation36_spill]]  ;;  %39 = sbr.rel (!%p37_p10) target bundleno = 31 (0x1f), region = 229 }
 0x880   : > { %s4429_s22 = sld [smem:[#allocation29_spill]] }
 0x881   : > { %s4430_s23 = sld [smem:[#allocation30_spill]] }
 0x882   : > { %s4431_s24 = sld [smem:[#allocation32_spill]] }
 0x883   : > { %s4432_s25 = sld [smem:[#allocation33_spill]] }
 0x884   :  { %2306 = vsyncpa [#allocation5], 1 }
 0x885   :  { %2308 = vsyncpa [#allocation5 + $0x1], 1 }
 0x886   :  { %2309 = vsyncpa [#allocation8], 1 }
 0x887   :  { %2311 = vsyncpa [#allocation8 + $0x1], 1 }
 0x888   :  { %2312 = vsyncpa [#allocation11], 1 }
 0x889   :  { %2314 = vsyncpa [#allocation11 + $0x1], 1 }
 0x88a   :  { %2315 = vsyncpa [#allocation14], 1 }
 0x88b   :  { %2317 = vsyncpa [#allocation14 + $0x1], 1 }
 0x88c   :  { %2318 = vsyncpa [#allocation6], 1 }
 0x88d   :  { %2320 = vsyncpa [#allocation6 + $0x1], 1 }

</bundles_post_ra>
